<compile_context>
chip_gen: v6e
topology: v6e:2x2x1
jax: 0.10.0
libtpu: 0.0.40
codegen_flags: <defaults>
</compile_context>

<pallas_src>
import jax
import jax.numpy as jnp
from jax.experimental import pallas as pl
from jax.experimental.pallas import tpu as pltpu


def word_module_kernel(tok_ref, topic_ref, wih_ref, b_ref, embp_ref,
                       whh_ref, wlin_ref, blin_ref, out_ref, xg_sc):
    # tok_ref : (B, T)  int32  SMEM      — token ids
    # topic   : (B, E)  f32               — topic embedding (t = 0 input)
    # wih     : (E, 4H) f32               — input projection (for topic row)
    # b       : (1, 4H) f32               — b_ih + b_hh
    # embp    : (V, 1, 4H) f32            — emb @ W_ih + b, pre-folded at init
    # whh     : (H, 4H) f32
    # wlin    : (H, Vp) f32,  blin: (1, Vp) f32
    # out     : (B, Vp) f32
    # xg_sc   : (S, B, 4H) f32 scratch    — per-step input-side gate terms
    S, B, G = xg_sc.shape
    H = whh_ref.shape[0]
    T = S - 1

    # t = 0: topic projection — one small MXU pass, off the serial chain.
    xg_sc[0] = (jnp.dot(topic_ref[...], wih_ref[...],
                        preferred_element_type=jnp.float32)
                + b_ref[...])                                      # (B, 4H)

    # t >= 1: gather pre-projected word rows (emb @ W_ih + b) by token id.
    # Token ids are scalars in SMEM; emb_proj rows are read with a dynamic
    # leading-axis index.  Fully unrolled (B*T = 16 tiny row copies).
    for t in range(T):
        rows = [embp_ref[tok_ref[bi, t]] for bi in range(B)]       # B x (1, 4H)
        xg_sc[t + 1] = jnp.concatenate(rows, axis=0)               # (B, 4H)

    h0 = jnp.zeros((B, H), jnp.float32)
    c0 = jnp.zeros((B, H), jnp.float32)

    def step(t, carry):
        h, c = carry
        # One MXU pass per step: (B,H) x (H,4H) -> single 128-lane gate vreg.
        gates = (jnp.dot(h, whh_ref[...], preferred_element_type=jnp.float32)
                 + xg_sc[t])                                       # (B, 4H)
        # Whole-vreg nonlinearities (EUP), then static 32-lane gate slices.
        sg = 1.0 / (1.0 + jnp.exp(-gates))
        tg = jnp.tanh(gates)
        i = sg[:, 0 * H:1 * H]
        f = sg[:, 1 * H:2 * H]
        g = tg[:, 2 * H:3 * H]
        o = sg[:, 3 * H:4 * H]
        c = f * c + i * g
        h = o * jnp.tanh(c)
        return (h, c)

    h_last, _ = jax.lax.fori_loop(0, S, step, (h0, c0), unroll=True)

    # output = linear(hidden[:, -1, :]) — one MXU pass + lane-dense store.
    out_ref[...] = (jnp.dot(h_last, wlin_ref[...],
                            preferred_element_type=jnp.float32)
                    + blin_ref[...])


def _round_up(x, m):
    return (x + m - 1) // m * m


def prepare_word_module_params(params):
    """One-time (init) parameter preparation — not on the per-call path."""
    f32 = jnp.float32
    emb = params["emb"].astype(f32)        # (V, E)
    w_ih = params["w_ih"].astype(f32)      # (E, 4H)
    w_hh = params["w_hh"].astype(f32)      # (H, 4H)
    b = params["b"].astype(f32)            # (1, 4H)
    w_lin = params["w_lin"].astype(f32)    # (H, V)
    b_lin = params["b_lin"].astype(f32)    # (1, V)

    V = w_lin.shape[1]
    Vp = _round_up(V, 128)

    # Fold embedding lookup + input projection + bias into one table:
    #   emb_proj[v] = emb[v] @ W_ih + b
    emb_proj = (emb @ w_ih + b)[:, None, :]                        # (V, 1, 4H)

    w_lin_p = jnp.pad(w_lin, ((0, 0), (0, Vp - V)))                # (H, Vp)
    b_lin_p = jnp.pad(b_lin, ((0, 0), (0, Vp - V)))                # (1, Vp)

    return dict(V=V, Vp=Vp, w_ih=w_ih, b=b, emb_proj=emb_proj,
                w_hh=w_hh, w_lin=w_lin_p, b_lin=b_lin_p)


def word_module_forward(topic, tokens, prepped):
    B, T = tokens.shape
    S = T + 1
    G = prepped["w_ih"].shape[1]           # 4H (packed gate width)
    V, Vp = prepped["V"], prepped["Vp"]

    vmem = pl.BlockSpec(memory_space=pltpu.MemorySpace.VMEM)
    smem = pl.BlockSpec(memory_space=pltpu.MemorySpace.SMEM)

    out_p = pl.pallas_call(
        word_module_kernel,
        out_shape=jax.ShapeDtypeStruct((B, Vp), jnp.float32),
        in_specs=[smem, vmem, vmem, vmem, vmem, vmem, vmem, vmem],
        out_specs=vmem,
        scratch_shapes=[pltpu.VMEM((S, B, G), jnp.float32)],       # xg
    )(tokens.astype(jnp.int32), topic.astype(jnp.float32),
      prepped["w_ih"], prepped["b"], prepped["emb_proj"],
      prepped["w_hh"], prepped["w_lin"], prepped["b_lin"])

    return out_p[:, :V]


def word_module_reference(topic, tokens, params):
    """Pure-JAX reference (mirrors torch nn.LSTM semantics, gate order i,f,g,o)."""
    emb, w_ih, w_hh, b = params["emb"], params["w_ih"], params["w_hh"], params["b"]
    w_lin, b_lin = params["w_lin"], params["b_lin"]
    H = w_hh.shape[0]

    word_embs = jnp.take(emb, tokens, axis=0)
    to_lstm = jnp.concatenate([topic[:, None, :], word_embs], axis=1)
    x_tm = jnp.transpose(to_lstm, (1, 0, 2)).astype(jnp.float32)

    B = tokens.shape[0]
    h0 = jnp.zeros((B, H), jnp.float32)
    c0 = jnp.zeros((B, H), jnp.float32)

    def scan_step(carry, x_t):
        h, c = carry
        gates = x_t @ w_ih + h @ w_hh + b
        i = jax.nn.sigmoid(gates[:, 0 * H:1 * H])
        f = jax.nn.sigmoid(gates[:, 1 * H:2 * H])
        g = jnp.tanh(gates[:, 2 * H:3 * H])
        o = jax.nn.sigmoid(gates[:, 3 * H:4 * H])
        c = f * c + i * g
        h = o * jnp.tanh(c)
        return (h, c), None

    (h_last, _), _ = jax.lax.scan(scan_step, (h0, c0), x_tm)
    return h_last @ w_lin + b_lin


if __name__ == "__main__":
    # small shapes consistent with the module:
    #   batch=2, tokens T=8, emb size E=32 (word_emb_size == attn_emb_size),
    #   lstm hidden H=32, vocab size V=40, single LSTM layer (dropout=0).
    B, T, E, H, V = 2, 8, 32, 32, 40
    init_embs = 0.1
    init_linear = 0.1

    key = jax.random.PRNGKey(0)
    ks = jax.random.split(key, 10)

    # Embedding(V, E), padding_idx=0 -> row 0 zeroed; uniform(-init_embs, init_embs)
    emb = jax.random.uniform(ks[0], (V, E), jnp.float32, -init_embs, init_embs)
    emb = emb.at[0].set(0.0)

    # nn.LSTM default init: U(-1/sqrt(H), 1/sqrt(H)); stored transposed (E,4H)/(H,4H)
    bound = 1.0 / (H ** 0.5)
    w_ih = jax.random.uniform(ks[1], (E, 4 * H), jnp.float32, -bound, bound)
    w_hh = jax.random.uniform(ks[2], (H, 4 * H), jnp.float32, -bound, bound)
    b_ih = jax.random.uniform(ks[3], (4 * H,), jnp.float32, -bound, bound)
    b_hh = jax.random.uniform(ks[4], (4 * H,), jnp.float32, -bound, bound)
    b = (b_ih + b_hh)[None, :]

    # Linear(H, V): weight uniform(-init_linear, init_linear), stored transposed (H,V)
    w_lin = jax.random.uniform(ks[5], (H, V), jnp.float32, -init_linear, init_linear)
    b_lin = jax.random.uniform(ks[6], (1, V), jnp.float32, -init_linear, init_linear)

    params = dict(emb=emb, w_ih=w_ih, w_hh=w_hh, b=b, w_lin=w_lin, b_lin=b_lin)

    topic = jax.random.normal(ks[7], (B, E), jnp.float32)              # (B, attn_emb_size)
    tokens = jax.random.randint(ks[8], (B, T), 0, V, dtype=jnp.int32)  # (B, T)

    # One-time parameter prep (init-time), kept off the per-call path.
    prepped = prepare_word_module_params(params)
    jax.block_until_ready(prepped)

    out = word_module_forward(topic, tokens, prepped)
    jax.block_until_ready(out)

    ref = word_module_reference(topic, tokens, params)
    assert out.shape == (B, V)
    assert jnp.allclose(out, ref, atol=1e-4, rtol=1e-4), "mismatch vs JAX reference"

    print("KERNEL_OK")
</pallas_src>

<mosaic_0001>
module attributes {stable_mosaic.version = 11 : i64} {
  func.func @word_module_kernel(%arg0: memref<2x8xi32, #tpu.memory_space<smem>>, %arg1: memref<2x32xf32, #tpu.memory_space<vmem>>, %arg2: memref<32x128xf32, #tpu.memory_space<vmem>>, %arg3: memref<1x128xf32, #tpu.memory_space<vmem>>, %arg4: memref<40x1x128xf32, #tpu.memory_space<vmem>>, %arg5: memref<32x128xf32, #tpu.memory_space<vmem>>, %arg6: memref<32x128xf32, #tpu.memory_space<vmem>>, %arg7: memref<1x128xf32, #tpu.memory_space<vmem>>, %arg8: memref<2x128xf32, #tpu.memory_space<vmem>>, %arg9: memref<9x2x128xf32, #tpu.memory_space<vmem>>) attributes {dimension_semantics = [], scalar_prefetch = 0 : i64, scratch_operands = 1 : i64, tpu.core_type = #tpu.core_type<tc>} {
    %c0 = arith.constant 0 : index
    %c0_0 = arith.constant 0 : index
    %0 = vector.load %arg1[%c0, %c0_0] : memref<2x32xf32, #tpu.memory_space<vmem>>, vector<2x32xf32>
    %c0_1 = arith.constant 0 : index
    %c0_2 = arith.constant 0 : index
    %1 = vector.load %arg2[%c0_1, %c0_2] : memref<32x128xf32, #tpu.memory_space<vmem>>, vector<32x128xf32>
    %cst = arith.constant dense<0.000000e+00> : vector<2x128xf32>
    %2 = tpu.matmul %0, %1, %cst {dimension_numbers = #tpu.dot_dimension_numbers<[1], [0], [0], [1], [0, 0, 1, 1], [], []>} : vector<2x32xf32>, vector<32x128xf32>, vector<2x128xf32> -> vector<2x128xf32>
    %c0_3 = arith.constant 0 : index
    %c0_4 = arith.constant 0 : index
    %3 = vector.load %arg3[%c0_3, %c0_4] : memref<1x128xf32, #tpu.memory_space<vmem>>, vector<1x128xf32>
    %4 = vector.broadcast %3 : vector<1x128xf32> to vector<2x128xf32>
    %5 = arith.addf %2, %4 : vector<2x128xf32>
    %c0_5 = arith.constant 0 : index
    %c0_6 = arith.constant 0 : index
    %c0_7 = arith.constant 0 : index
    %6 = vector.load %arg9[%c0_5, %c0_6, %c0_7] : memref<9x2x128xf32, #tpu.memory_space<vmem>>, vector<1x2x128xf32>
    %7 = vector.shape_cast %6 : vector<1x2x128xf32> to vector<2x128xf32>
    %8 = vector.shape_cast %5 : vector<2x128xf32> to vector<1x2x128xf32>
    tpu.vector_store %arg9[%c0_5, %c0_6, %c0_7], %8 {strides = array<i32>} : memref<9x2x128xf32, #tpu.memory_space<vmem>>, vector<1x2x128xf32>,
    %c0_8 = arith.constant 0 : index
    %c0_9 = arith.constant 0 : index
    %9 = memref.load %arg0[%c0_8, %c0_9] : memref<2x8xi32, #tpu.memory_space<smem>>
    %10 = arith.index_cast %9 : i32 to index
    %c0_10 = arith.constant 0 : index
    %c0_11 = arith.constant 0 : index
    %11 = vector.load %arg4[%10, %c0_10, %c0_11] : memref<40x1x128xf32, #tpu.memory_space<vmem>>, vector<1x1x128xf32>
    %12 = vector.shape_cast %11 : vector<1x1x128xf32> to vector<1x128xf32>
    %c1 = arith.constant 1 : index
    %c0_12 = arith.constant 0 : index
    %13 = memref.load %arg0[%c1, %c0_12] : memref<2x8xi32, #tpu.memory_space<smem>>
    %14 = arith.index_cast %13 : i32 to index
    %c0_13 = arith.constant 0 : index
    %c0_14 = arith.constant 0 : index
    %15 = vector.load %arg4[%14, %c0_13, %c0_14] : memref<40x1x128xf32, #tpu.memory_space<vmem>>, vector<1x1x128xf32>
    %16 = vector.shape_cast %15 : vector<1x1x128xf32> to vector<1x128xf32>
    %17 = tpu.concatenate %12, %16 in 0 : vector<1x128xf32>, vector<1x128xf32> -> vector<2x128xf32>
    %c1_15 = arith.constant 1 : index
    %c0_16 = arith.constant 0 : index
    %c0_17 = arith.constant 0 : index
    %18 = vector.load %arg9[%c1_15, %c0_16, %c0_17] : memref<9x2x128xf32, #tpu.memory_space<vmem>>, vector<1x2x128xf32>
    %19 = vector.shape_cast %18 : vector<1x2x128xf32> to vector<2x128xf32>
    %20 = vector.shape_cast %17 : vector<2x128xf32> to vector<1x2x128xf32>
    tpu.vector_store %arg9[%c1_15, %c0_16, %c0_17], %20 {strides = array<i32>} : memref<9x2x128xf32, #tpu.memory_space<vmem>>, vector<1x2x128xf32>,
    %c0_18 = arith.constant 0 : index
    %c1_19 = arith.constant 1 : index
    %21 = memref.load %arg0[%c0_18, %c1_19] : memref<2x8xi32, #tpu.memory_space<smem>>
    %22 = arith.index_cast %21 : i32 to index
    %c0_20 = arith.constant 0 : index
    %c0_21 = arith.constant 0 : index
    %23 = vector.load %arg4[%22, %c0_20, %c0_21] : memref<40x1x128xf32, #tpu.memory_space<vmem>>, vector<1x1x128xf32>
    %24 = vector.shape_cast %23 : vector<1x1x128xf32> to vector<1x128xf32>
    %c1_22 = arith.constant 1 : index
    %c1_23 = arith.constant 1 : index
    %25 = memref.load %arg0[%c1_22, %c1_23] : memref<2x8xi32, #tpu.memory_space<smem>>
    %26 = arith.index_cast %25 : i32 to index
    %c0_24 = arith.constant 0 : index
    %c0_25 = arith.constant 0 : index
    %27 = vector.load %arg4[%26, %c0_24, %c0_25] : memref<40x1x128xf32, #tpu.memory_space<vmem>>, vector<1x1x128xf32>
    %28 = vector.shape_cast %27 : vector<1x1x128xf32> to vector<1x128xf32>
    %29 = tpu.concatenate %24, %28 in 0 : vector<1x128xf32>, vector<1x128xf32> -> vector<2x128xf32>
    %c2 = arith.constant 2 : index
    %c0_26 = arith.constant 0 : index
    %c0_27 = arith.constant 0 : index
    %30 = vector.load %arg9[%c2, %c0_26, %c0_27] : memref<9x2x128xf32, #tpu.memory_space<vmem>>, vector<1x2x128xf32>
    %31 = vector.shape_cast %30 : vector<1x2x128xf32> to vector<2x128xf32>
    %32 = vector.shape_cast %29 : vector<2x128xf32> to vector<1x2x128xf32>
    tpu.vector_store %arg9[%c2, %c0_26, %c0_27], %32 {strides = array<i32>} : memref<9x2x128xf32, #tpu.memory_space<vmem>>, vector<1x2x128xf32>,
    %c0_28 = arith.constant 0 : index
    %c2_29 = arith.constant 2 : index
    %33 = memref.load %arg0[%c0_28, %c2_29] : memref<2x8xi32, #tpu.memory_space<smem>>
    %34 = arith.index_cast %33 : i32 to index
    %c0_30 = arith.constant 0 : index
    %c0_31 = arith.constant 0 : index
    %35 = vector.load %arg4[%34, %c0_30, %c0_31] : memref<40x1x128xf32, #tpu.memory_space<vmem>>, vector<1x1x128xf32>
    %36 = vector.shape_cast %35 : vector<1x1x128xf32> to vector<1x128xf32>
    %c1_32 = arith.constant 1 : index
    %c2_33 = arith.constant 2 : index
    %37 = memref.load %arg0[%c1_32, %c2_33] : memref<2x8xi32, #tpu.memory_space<smem>>
    %38 = arith.index_cast %37 : i32 to index
    %c0_34 = arith.constant 0 : index
    %c0_35 = arith.constant 0 : index
    %39 = vector.load %arg4[%38, %c0_34, %c0_35] : memref<40x1x128xf32, #tpu.memory_space<vmem>>, vector<1x1x128xf32>
    %40 = vector.shape_cast %39 : vector<1x1x128xf32> to vector<1x128xf32>
    %41 = tpu.concatenate %36, %40 in 0 : vector<1x128xf32>, vector<1x128xf32> -> vector<2x128xf32>
    %c3 = arith.constant 3 : index
    %c0_36 = arith.constant 0 : index
    %c0_37 = arith.constant 0 : index
    %42 = vector.load %arg9[%c3, %c0_36, %c0_37] : memref<9x2x128xf32, #tpu.memory_space<vmem>>, vector<1x2x128xf32>
    %43 = vector.shape_cast %42 : vector<1x2x128xf32> to vector<2x128xf32>
    %44 = vector.shape_cast %41 : vector<2x128xf32> to vector<1x2x128xf32>
    tpu.vector_store %arg9[%c3, %c0_36, %c0_37], %44 {strides = array<i32>} : memref<9x2x128xf32, #tpu.memory_space<vmem>>, vector<1x2x128xf32>,
    %c0_38 = arith.constant 0 : index
    %c3_39 = arith.constant 3 : index
    %45 = memref.load %arg0[%c0_38, %c3_39] : memref<2x8xi32, #tpu.memory_space<smem>>
    %46 = arith.index_cast %45 : i32 to index
    %c0_40 = arith.constant 0 : index
    %c0_41 = arith.constant 0 : index
    %47 = vector.load %arg4[%46, %c0_40, %c0_41] : memref<40x1x128xf32, #tpu.memory_space<vmem>>, vector<1x1x128xf32>
    %48 = vector.shape_cast %47 : vector<1x1x128xf32> to vector<1x128xf32>
    %c1_42 = arith.constant 1 : index
    %c3_43 = arith.constant 3 : index
    %49 = memref.load %arg0[%c1_42, %c3_43] : memref<2x8xi32, #tpu.memory_space<smem>>
    %50 = arith.index_cast %49 : i32 to index
    %c0_44 = arith.constant 0 : index
    %c0_45 = arith.constant 0 : index
    %51 = vector.load %arg4[%50, %c0_44, %c0_45] : memref<40x1x128xf32, #tpu.memory_space<vmem>>, vector<1x1x128xf32>
    %52 = vector.shape_cast %51 : vector<1x1x128xf32> to vector<1x128xf32>
    %53 = tpu.concatenate %48, %52 in 0 : vector<1x128xf32>, vector<1x128xf32> -> vector<2x128xf32>
    %c4 = arith.constant 4 : index
    %c0_46 = arith.constant 0 : index
    %c0_47 = arith.constant 0 : index
    %54 = vector.load %arg9[%c4, %c0_46, %c0_47] : memref<9x2x128xf32, #tpu.memory_space<vmem>>, vector<1x2x128xf32>
    %55 = vector.shape_cast %54 : vector<1x2x128xf32> to vector<2x128xf32>
    %56 = vector.shape_cast %53 : vector<2x128xf32> to vector<1x2x128xf32>
    tpu.vector_store %arg9[%c4, %c0_46, %c0_47], %56 {strides = array<i32>} : memref<9x2x128xf32, #tpu.memory_space<vmem>>, vector<1x2x128xf32>,
    %c0_48 = arith.constant 0 : index
    %c4_49 = arith.constant 4 : index
    %57 = memref.load %arg0[%c0_48, %c4_49] : memref<2x8xi32, #tpu.memory_space<smem>>
    %58 = arith.index_cast %57 : i32 to index
    %c0_50 = arith.constant 0 : index
    %c0_51 = arith.constant 0 : index
    %59 = vector.load %arg4[%58, %c0_50, %c0_51] : memref<40x1x128xf32, #tpu.memory_space<vmem>>, vector<1x1x128xf32>
    %60 = vector.shape_cast %59 : vector<1x1x128xf32> to vector<1x128xf32>
    %c1_52 = arith.constant 1 : index
    %c4_53 = arith.constant 4 : index
    %61 = memref.load %arg0[%c1_52, %c4_53] : memref<2x8xi32, #tpu.memory_space<smem>>
    %62 = arith.index_cast %61 : i32 to index
    %c0_54 = arith.constant 0 : index
    %c0_55 = arith.constant 0 : index
    %63 = vector.load %arg4[%62, %c0_54, %c0_55] : memref<40x1x128xf32, #tpu.memory_space<vmem>>, vector<1x1x128xf32>
    %64 = vector.shape_cast %63 : vector<1x1x128xf32> to vector<1x128xf32>
    %65 = tpu.concatenate %60, %64 in 0 : vector<1x128xf32>, vector<1x128xf32> -> vector<2x128xf32>
    %c5 = arith.constant 5 : index
    %c0_56 = arith.constant 0 : index
    %c0_57 = arith.constant 0 : index
    %66 = vector.load %arg9[%c5, %c0_56, %c0_57] : memref<9x2x128xf32, #tpu.memory_space<vmem>>, vector<1x2x128xf32>
    %67 = vector.shape_cast %66 : vector<1x2x128xf32> to vector<2x128xf32>
    %68 = vector.shape_cast %65 : vector<2x128xf32> to vector<1x2x128xf32>
    tpu.vector_store %arg9[%c5, %c0_56, %c0_57], %68 {strides = array<i32>} : memref<9x2x128xf32, #tpu.memory_space<vmem>>, vector<1x2x128xf32>,
    %c0_58 = arith.constant 0 : index
    %c5_59 = arith.constant 5 : index
    %69 = memref.load %arg0[%c0_58, %c5_59] : memref<2x8xi32, #tpu.memory_space<smem>>
    %70 = arith.index_cast %69 : i32 to index
    %c0_60 = arith.constant 0 : index
    %c0_61 = arith.constant 0 : index
    %71 = vector.load %arg4[%70, %c0_60, %c0_61] : memref<40x1x128xf32, #tpu.memory_space<vmem>>, vector<1x1x128xf32>
    %72 = vector.shape_cast %71 : vector<1x1x128xf32> to vector<1x128xf32>
    %c1_62 = arith.constant 1 : index
    %c5_63 = arith.constant 5 : index
    %73 = memref.load %arg0[%c1_62, %c5_63] : memref<2x8xi32, #tpu.memory_space<smem>>
    %74 = arith.index_cast %73 : i32 to index
    %c0_64 = arith.constant 0 : index
    %c0_65 = arith.constant 0 : index
    %75 = vector.load %arg4[%74, %c0_64, %c0_65] : memref<40x1x128xf32, #tpu.memory_space<vmem>>, vector<1x1x128xf32>
    %76 = vector.shape_cast %75 : vector<1x1x128xf32> to vector<1x128xf32>
    %77 = tpu.concatenate %72, %76 in 0 : vector<1x128xf32>, vector<1x128xf32> -> vector<2x128xf32>
    %c6 = arith.constant 6 : index
    %c0_66 = arith.constant 0 : index
    %c0_67 = arith.constant 0 : index
    %78 = vector.load %arg9[%c6, %c0_66, %c0_67] : memref<9x2x128xf32, #tpu.memory_space<vmem>>, vector<1x2x128xf32>
    %79 = vector.shape_cast %78 : vector<1x2x128xf32> to vector<2x128xf32>
    %80 = vector.shape_cast %77 : vector<2x128xf32> to vector<1x2x128xf32>
    tpu.vector_store %arg9[%c6, %c0_66, %c0_67], %80 {strides = array<i32>} : memref<9x2x128xf32, #tpu.memory_space<vmem>>, vector<1x2x128xf32>,
    %c0_68 = arith.constant 0 : index
    %c6_69 = arith.constant 6 : index
    %81 = memref.load %arg0[%c0_68, %c6_69] : memref<2x8xi32, #tpu.memory_space<smem>>
    %82 = arith.index_cast %81 : i32 to index
    %c0_70 = arith.constant 0 : index
    %c0_71 = arith.constant 0 : index
    %83 = vector.load %arg4[%82, %c0_70, %c0_71] : memref<40x1x128xf32, #tpu.memory_space<vmem>>, vector<1x1x128xf32>
    %84 = vector.shape_cast %83 : vector<1x1x128xf32> to vector<1x128xf32>
    %c1_72 = arith.constant 1 : index
    %c6_73 = arith.constant 6 : index
    %85 = memref.load %arg0[%c1_72, %c6_73] : memref<2x8xi32, #tpu.memory_space<smem>>
    %86 = arith.index_cast %85 : i32 to index
    %c0_74 = arith.constant 0 : index
    %c0_75 = arith.constant 0 : index
    %87 = vector.load %arg4[%86, %c0_74, %c0_75] : memref<40x1x128xf32, #tpu.memory_space<vmem>>, vector<1x1x128xf32>
    %88 = vector.shape_cast %87 : vector<1x1x128xf32> to vector<1x128xf32>
    %89 = tpu.concatenate %84, %88 in 0 : vector<1x128xf32>, vector<1x128xf32> -> vector<2x128xf32>
    %c7 = arith.constant 7 : index
    %c0_76 = arith.constant 0 : index
    %c0_77 = arith.constant 0 : index
    %90 = vector.load %arg9[%c7, %c0_76, %c0_77] : memref<9x2x128xf32, #tpu.memory_space<vmem>>, vector<1x2x128xf32>
    %91 = vector.shape_cast %90 : vector<1x2x128xf32> to vector<2x128xf32>
    %92 = vector.shape_cast %89 : vector<2x128xf32> to vector<1x2x128xf32>
    tpu.vector_store %arg9[%c7, %c0_76, %c0_77], %92 {strides = array<i32>} : memref<9x2x128xf32, #tpu.memory_space<vmem>>, vector<1x2x128xf32>,
    %c0_78 = arith.constant 0 : index
    %c7_79 = arith.constant 7 : index
    %93 = memref.load %arg0[%c0_78, %c7_79] : memref<2x8xi32, #tpu.memory_space<smem>>
    %94 = arith.index_cast %93 : i32 to index
    %c0_80 = arith.constant 0 : index
    %c0_81 = arith.constant 0 : index
    %95 = vector.load %arg4[%94, %c0_80, %c0_81] : memref<40x1x128xf32, #tpu.memory_space<vmem>>, vector<1x1x128xf32>
    %96 = vector.shape_cast %95 : vector<1x1x128xf32> to vector<1x128xf32>
    %c1_82 = arith.constant 1 : index
    %c7_83 = arith.constant 7 : index
    %97 = memref.load %arg0[%c1_82, %c7_83] : memref<2x8xi32, #tpu.memory_space<smem>>
    %98 = arith.index_cast %97 : i32 to index
    %c0_84 = arith.constant 0 : index
    %c0_85 = arith.constant 0 : index
    %99 = vector.load %arg4[%98, %c0_84, %c0_85] : memref<40x1x128xf32, #tpu.memory_space<vmem>>, vector<1x1x128xf32>
    %100 = vector.shape_cast %99 : vector<1x1x128xf32> to vector<1x128xf32>
    %101 = tpu.concatenate %96, %100 in 0 : vector<1x128xf32>, vector<1x128xf32> -> vector<2x128xf32>
    %c8 = arith.constant 8 : index
    %c0_86 = arith.constant 0 : index
    %c0_87 = arith.constant 0 : index
    %102 = vector.load %arg9[%c8, %c0_86, %c0_87] : memref<9x2x128xf32, #tpu.memory_space<vmem>>, vector<1x2x128xf32>
    %103 = vector.shape_cast %102 : vector<1x2x128xf32> to vector<2x128xf32>
    %104 = vector.shape_cast %101 : vector<2x128xf32> to vector<1x2x128xf32>
    tpu.vector_store %arg9[%c8, %c0_86, %c0_87], %104 {strides = array<i32>} : memref<9x2x128xf32, #tpu.memory_space<vmem>>, vector<1x2x128xf32>,
    %cst_88 = arith.constant 0.000000e+00 : f32
    %105 = vector.broadcast %cst_88 : f32 to vector<2x32xf32>
    %cst_89 = arith.constant 0.000000e+00 : f32
    %106 = vector.broadcast %cst_89 : f32 to vector<2x32xf32>
    %c0_i32 = arith.constant 0 : i32
    %c0_90 = arith.constant 0 : index
    %c0_91 = arith.constant 0 : index
    %107 = vector.load %arg5[%c0_90, %c0_91] : memref<32x128xf32, #tpu.memory_space<vmem>>, vector<32x128xf32>
    %cst_92 = arith.constant dense<0.000000e+00> : vector<2x128xf32>
    %108 = tpu.matmul %105, %107, %cst_92 {dimension_numbers = #tpu.dot_dimension_numbers<[1], [0], [0], [1], [0, 0, 1, 1], [], []>} : vector<2x32xf32>, vector<32x128xf32>, vector<2x128xf32> -> vector<2x128xf32>
    %109 = arith.index_cast %c0_i32 : i32 to index
    %c0_93 = arith.constant 0 : index
    %c0_94 = arith.constant 0 : index
    %110 = vector.load %arg9[%109, %c0_93, %c0_94] : memref<9x2x128xf32, #tpu.memory_space<vmem>>, vector<1x2x128xf32>
    %111 = vector.shape_cast %110 : vector<1x2x128xf32> to vector<2x128xf32>
    %112 = arith.addf %108, %111 : vector<2x128xf32>
    %cst_95 = arith.constant 0.000000e+00 : f32
    %113 = vector.broadcast %cst_95 : f32 to vector<2x128xf32>
    %114 = arith.subf %113, %112 : vector<2x128xf32>
    %115 = math.exp %114 : vector<2x128xf32>
    %cst_96 = arith.constant 1.000000e+00 : f32
    %116 = vector.broadcast %cst_96 : f32 to vector<2x128xf32>
    %117 = arith.addf %116, %115 : vector<2x128xf32>
    %cst_97 = arith.constant 1.000000e+00 : f32
    %118 = vector.broadcast %cst_97 : f32 to vector<2x128xf32>
    %119 = arith.divf %118, %117 : vector<2x128xf32>
    %120 = math.tanh %112 : vector<2x128xf32>
    %121 = vector.extract_strided_slice %119 {offsets = [0, 0], sizes = [2, 32], strides = [1, 1]} : vector<2x128xf32> to vector<2x32xf32>
    %122 = vector.extract_strided_slice %119 {offsets = [0, 32], sizes = [2, 32], strides = [1, 1]} : vector<2x128xf32> to vector<2x32xf32>
    %123 = vector.extract_strided_slice %120 {offsets = [0, 64], sizes = [2, 32], strides = [1, 1]} : vector<2x128xf32> to vector<2x32xf32>
    %124 = vector.extract_strided_slice %119 {offsets = [0, 96], sizes = [2, 32], strides = [1, 1]} : vector<2x128xf32> to vector<2x32xf32>
    %125 = arith.mulf %122, %106 : vector<2x32xf32>
    %126 = arith.mulf %121, %123 : vector<2x32xf32>
    %127 = arith.addf %125, %126 : vector<2x32xf32>
    %128 = math.tanh %127 : vector<2x32xf32>
    %129 = arith.mulf %124, %128 : vector<2x32xf32>
    %c1_i32 = arith.constant 1 : i32
    %c0_98 = arith.constant 0 : index
    %c0_99 = arith.constant 0 : index
    %130 = vector.load %arg5[%c0_98, %c0_99] : memref<32x128xf32, #tpu.memory_space<vmem>>, vector<32x128xf32>
    %cst_100 = arith.constant dense<0.000000e+00> : vector<2x128xf32>
    %131 = tpu.matmul %129, %130, %cst_100 {dimension_numbers = #tpu.dot_dimension_numbers<[1], [0], [0], [1], [0, 0, 1, 1], [], []>} : vector<2x32xf32>, vector<32x128xf32>, vector<2x128xf32> -> vector<2x128xf32>
    %132 = arith.index_cast %c1_i32 : i32 to index
    %c0_101 = arith.constant 0 : index
    %c0_102 = arith.constant 0 : index
    %133 = vector.load %arg9[%132, %c0_101, %c0_102] : memref<9x2x128xf32, #tpu.memory_space<vmem>>, vector<1x2x128xf32>
    %134 = vector.shape_cast %133 : vector<1x2x128xf32> to vector<2x128xf32>
    %135 = arith.addf %131, %134 : vector<2x128xf32>
    %cst_103 = arith.constant 0.000000e+00 : f32
    %136 = vector.broadcast %cst_103 : f32 to vector<2x128xf32>
    %137 = arith.subf %136, %135 : vector<2x128xf32>
    %138 = math.exp %137 : vector<2x128xf32>
    %cst_104 = arith.constant 1.000000e+00 : f32
    %139 = vector.broadcast %cst_104 : f32 to vector<2x128xf32>
    %140 = arith.addf %139, %138 : vector<2x128xf32>
    %cst_105 = arith.constant 1.000000e+00 : f32
    %141 = vector.broadcast %cst_105 : f32 to vector<2x128xf32>
    %142 = arith.divf %141, %140 : vector<2x128xf32>
    %143 = math.tanh %135 : vector<2x128xf32>
    %144 = vector.extract_strided_slice %142 {offsets = [0, 0], sizes = [2, 32], strides = [1, 1]} : vector<2x128xf32> to vector<2x32xf32>
    %145 = vector.extract_strided_slice %142 {offsets = [0, 32], sizes = [2, 32], strides = [1, 1]} : vector<2x128xf32> to vector<2x32xf32>
    %146 = vector.extract_strided_slice %143 {offsets = [0, 64], sizes = [2, 32], strides = [1, 1]} : vector<2x128xf32> to vector<2x32xf32>
    %147 = vector.extract_strided_slice %142 {offsets = [0, 96], sizes = [2, 32], strides = [1, 1]} : vector<2x128xf32> to vector<2x32xf32>
    %148 = arith.mulf %145, %127 : vector<2x32xf32>
    %149 = arith.mulf %144, %146 : vector<2x32xf32>
    %150 = arith.addf %148, %149 : vector<2x32xf32>
    %151 = math.tanh %150 : vector<2x32xf32>
    %152 = arith.mulf %147, %151 : vector<2x32xf32>
    %c2_i32 = arith.constant 2 : i32
    %c0_106 = arith.constant 0 : index
    %c0_107 = arith.constant 0 : index
    %153 = vector.load %arg5[%c0_106, %c0_107] : memref<32x128xf32, #tpu.memory_space<vmem>>, vector<32x128xf32>
    %cst_108 = arith.constant dense<0.000000e+00> : vector<2x128xf32>
    %154 = tpu.matmul %152, %153, %cst_108 {dimension_numbers = #tpu.dot_dimension_numbers<[1], [0], [0], [1], [0, 0, 1, 1], [], []>} : vector<2x32xf32>, vector<32x128xf32>, vector<2x128xf32> -> vector<2x128xf32>
    %155 = arith.index_cast %c2_i32 : i32 to index
    %c0_109 = arith.constant 0 : index
    %c0_110 = arith.constant 0 : index
    %156 = vector.load %arg9[%155, %c0_109, %c0_110] : memref<9x2x128xf32, #tpu.memory_space<vmem>>, vector<1x2x128xf32>
    %157 = vector.shape_cast %156 : vector<1x2x128xf32> to vector<2x128xf32>
    %158 = arith.addf %154, %157 : vector<2x128xf32>
    %cst_111 = arith.constant 0.000000e+00 : f32
    %159 = vector.broadcast %cst_111 : f32 to vector<2x128xf32>
    %160 = arith.subf %159, %158 : vector<2x128xf32>
    %161 = math.exp %160 : vector<2x128xf32>
    %cst_112 = arith.constant 1.000000e+00 : f32
    %162 = vector.broadcast %cst_112 : f32 to vector<2x128xf32>
    %163 = arith.addf %162, %161 : vector<2x128xf32>
    %cst_113 = arith.constant 1.000000e+00 : f32
    %164 = vector.broadcast %cst_113 : f32 to vector<2x128xf32>
    %165 = arith.divf %164, %163 : vector<2x128xf32>
    %166 = math.tanh %158 : vector<2x128xf32>
    %167 = vector.extract_strided_slice %165 {offsets = [0, 0], sizes = [2, 32], strides = [1, 1]} : vector<2x128xf32> to vector<2x32xf32>
    %168 = vector.extract_strided_slice %165 {offsets = [0, 32], sizes = [2, 32], strides = [1, 1]} : vector<2x128xf32> to vector<2x32xf32>
    %169 = vector.extract_strided_slice %166 {offsets = [0, 64], sizes = [2, 32], strides = [1, 1]} : vector<2x128xf32> to vector<2x32xf32>
    %170 = vector.extract_strided_slice %165 {offsets = [0, 96], sizes = [2, 32], strides = [1, 1]} : vector<2x128xf32> to vector<2x32xf32>
    %171 = arith.mulf %168, %150 : vector<2x32xf32>
    %172 = arith.mulf %167, %169 : vector<2x32xf32>
    %173 = arith.addf %171, %172 : vector<2x32xf32>
    %174 = math.tanh %173 : vector<2x32xf32>
    %175 = arith.mulf %170, %174 : vector<2x32xf32>
    %c3_i32 = arith.constant 3 : i32
    %c0_114 = arith.constant 0 : index
    %c0_115 = arith.constant 0 : index
    %176 = vector.load %arg5[%c0_114, %c0_115] : memref<32x128xf32, #tpu.memory_space<vmem>>, vector<32x128xf32>
    %cst_116 = arith.constant dense<0.000000e+00> : vector<2x128xf32>
    %177 = tpu.matmul %175, %176, %cst_116 {dimension_numbers = #tpu.dot_dimension_numbers<[1], [0], [0], [1], [0, 0, 1, 1], [], []>} : vector<2x32xf32>, vector<32x128xf32>, vector<2x128xf32> -> vector<2x128xf32>
    %178 = arith.index_cast %c3_i32 : i32 to index
    %c0_117 = arith.constant 0 : index
    %c0_118 = arith.constant 0 : index
    %179 = vector.load %arg9[%178, %c0_117, %c0_118] : memref<9x2x128xf32, #tpu.memory_space<vmem>>, vector<1x2x128xf32>
    %180 = vector.shape_cast %179 : vector<1x2x128xf32> to vector<2x128xf32>
    %181 = arith.addf %177, %180 : vector<2x128xf32>
    %cst_119 = arith.constant 0.000000e+00 : f32
    %182 = vector.broadcast %cst_119 : f32 to vector<2x128xf32>
    %183 = arith.subf %182, %181 : vector<2x128xf32>
    %184 = math.exp %183 : vector<2x128xf32>
    %cst_120 = arith.constant 1.000000e+00 : f32
    %185 = vector.broadcast %cst_120 : f32 to vector<2x128xf32>
    %186 = arith.addf %185, %184 : vector<2x128xf32>
    %cst_121 = arith.constant 1.000000e+00 : f32
    %187 = vector.broadcast %cst_121 : f32 to vector<2x128xf32>
    %188 = arith.divf %187, %186 : vector<2x128xf32>
    %189 = math.tanh %181 : vector<2x128xf32>
    %190 = vector.extract_strided_slice %188 {offsets = [0, 0], sizes = [2, 32], strides = [1, 1]} : vector<2x128xf32> to vector<2x32xf32>
    %191 = vector.extract_strided_slice %188 {offsets = [0, 32], sizes = [2, 32], strides = [1, 1]} : vector<2x128xf32> to vector<2x32xf32>
    %192 = vector.extract_strided_slice %189 {offsets = [0, 64], sizes = [2, 32], strides = [1, 1]} : vector<2x128xf32> to vector<2x32xf32>
    %193 = vector.extract_strided_slice %188 {offsets = [0, 96], sizes = [2, 32], strides = [1, 1]} : vector<2x128xf32> to vector<2x32xf32>
    %194 = arith.mulf %191, %173 : vector<2x32xf32>
    %195 = arith.mulf %190, %192 : vector<2x32xf32>
    %196 = arith.addf %194, %195 : vector<2x32xf32>
    %197 = math.tanh %196 : vector<2x32xf32>
    %198 = arith.mulf %193, %197 : vector<2x32xf32>
    %c4_i32 = arith.constant 4 : i32
    %c0_122 = arith.constant 0 : index
    %c0_123 = arith.constant 0 : index
    %199 = vector.load %arg5[%c0_122, %c0_123] : memref<32x128xf32, #tpu.memory_space<vmem>>, vector<32x128xf32>
    %cst_124 = arith.constant dense<0.000000e+00> : vector<2x128xf32>
    %200 = tpu.matmul %198, %199, %cst_124 {dimension_numbers = #tpu.dot_dimension_numbers<[1], [0], [0], [1], [0, 0, 1, 1], [], []>} : vector<2x32xf32>, vector<32x128xf32>, vector<2x128xf32> -> vector<2x128xf32>
    %201 = arith.index_cast %c4_i32 : i32 to index
    %c0_125 = arith.constant 0 : index
    %c0_126 = arith.constant 0 : index
    %202 = vector.load %arg9[%201, %c0_125, %c0_126] : memref<9x2x128xf32, #tpu.memory_space<vmem>>, vector<1x2x128xf32>
    %203 = vector.shape_cast %202 : vector<1x2x128xf32> to vector<2x128xf32>
    %204 = arith.addf %200, %203 : vector<2x128xf32>
    %cst_127 = arith.constant 0.000000e+00 : f32
    %205 = vector.broadcast %cst_127 : f32 to vector<2x128xf32>
    %206 = arith.subf %205, %204 : vector<2x128xf32>
    %207 = math.exp %206 : vector<2x128xf32>
    %cst_128 = arith.constant 1.000000e+00 : f32
    %208 = vector.broadcast %cst_128 : f32 to vector<2x128xf32>
    %209 = arith.addf %208, %207 : vector<2x128xf32>
    %cst_129 = arith.constant 1.000000e+00 : f32
    %210 = vector.broadcast %cst_129 : f32 to vector<2x128xf32>
    %211 = arith.divf %210, %209 : vector<2x128xf32>
    %212 = math.tanh %204 : vector<2x128xf32>
    %213 = vector.extract_strided_slice %211 {offsets = [0, 0], sizes = [2, 32], strides = [1, 1]} : vector<2x128xf32> to vector<2x32xf32>
    %214 = vector.extract_strided_slice %211 {offsets = [0, 32], sizes = [2, 32], strides = [1, 1]} : vector<2x128xf32> to vector<2x32xf32>
    %215 = vector.extract_strided_slice %212 {offsets = [0, 64], sizes = [2, 32], strides = [1, 1]} : vector<2x128xf32> to vector<2x32xf32>
    %216 = vector.extract_strided_slice %211 {offsets = [0, 96], sizes = [2, 32], strides = [1, 1]} : vector<2x128xf32> to vector<2x32xf32>
    %217 = arith.mulf %214, %196 : vector<2x32xf32>
    %218 = arith.mulf %213, %215 : vector<2x32xf32>
    %219 = arith.addf %217, %218 : vector<2x32xf32>
    %220 = math.tanh %219 : vector<2x32xf32>
    %221 = arith.mulf %216, %220 : vector<2x32xf32>
    %c5_i32 = arith.constant 5 : i32
    %c0_130 = arith.constant 0 : index
    %c0_131 = arith.constant 0 : index
    %222 = vector.load %arg5[%c0_130, %c0_131] : memref<32x128xf32, #tpu.memory_space<vmem>>, vector<32x128xf32>
    %cst_132 = arith.constant dense<0.000000e+00> : vector<2x128xf32>
    %223 = tpu.matmul %221, %222, %cst_132 {dimension_numbers = #tpu.dot_dimension_numbers<[1], [0], [0], [1], [0, 0, 1, 1], [], []>} : vector<2x32xf32>, vector<32x128xf32>, vector<2x128xf32> -> vector<2x128xf32>
    %224 = arith.index_cast %c5_i32 : i32 to index
    %c0_133 = arith.constant 0 : index
    %c0_134 = arith.constant 0 : index
    %225 = vector.load %arg9[%224, %c0_133, %c0_134] : memref<9x2x128xf32, #tpu.memory_space<vmem>>, vector<1x2x128xf32>
    %226 = vector.shape_cast %225 : vector<1x2x128xf32> to vector<2x128xf32>
    %227 = arith.addf %223, %226 : vector<2x128xf32>
    %cst_135 = arith.constant 0.000000e+00 : f32
    %228 = vector.broadcast %cst_135 : f32 to vector<2x128xf32>
    %229 = arith.subf %228, %227 : vector<2x128xf32>
    %230 = math.exp %229 : vector<2x128xf32>
    %cst_136 = arith.constant 1.000000e+00 : f32
    %231 = vector.broadcast %cst_136 : f32 to vector<2x128xf32>
    %232 = arith.addf %231, %230 : vector<2x128xf32>
    %cst_137 = arith.constant 1.000000e+00 : f32
    %233 = vector.broadcast %cst_137 : f32 to vector<2x128xf32>
    %234 = arith.divf %233, %232 : vector<2x128xf32>
    %235 = math.tanh %227 : vector<2x128xf32>
    %236 = vector.extract_strided_slice %234 {offsets = [0, 0], sizes = [2, 32], strides = [1, 1]} : vector<2x128xf32> to vector<2x32xf32>
    %237 = vector.extract_strided_slice %234 {offsets = [0, 32], sizes = [2, 32], strides = [1, 1]} : vector<2x128xf32> to vector<2x32xf32>
    %238 = vector.extract_strided_slice %235 {offsets = [0, 64], sizes = [2, 32], strides = [1, 1]} : vector<2x128xf32> to vector<2x32xf32>
    %239 = vector.extract_strided_slice %234 {offsets = [0, 96], sizes = [2, 32], strides = [1, 1]} : vector<2x128xf32> to vector<2x32xf32>
    %240 = arith.mulf %237, %219 : vector<2x32xf32>
    %241 = arith.mulf %236, %238 : vector<2x32xf32>
    %242 = arith.addf %240, %241 : vector<2x32xf32>
    %243 = math.tanh %242 : vector<2x32xf32>
    %244 = arith.mulf %239, %243 : vector<2x32xf32>
    %c6_i32 = arith.constant 6 : i32
    %c0_138 = arith.constant 0 : index
    %c0_139 = arith.constant 0 : index
    %245 = vector.load %arg5[%c0_138, %c0_139] : memref<32x128xf32, #tpu.memory_space<vmem>>, vector<32x128xf32>
    %cst_140 = arith.constant dense<0.000000e+00> : vector<2x128xf32>
    %246 = tpu.matmul %244, %245, %cst_140 {dimension_numbers = #tpu.dot_dimension_numbers<[1], [0], [0], [1], [0, 0, 1, 1], [], []>} : vector<2x32xf32>, vector<32x128xf32>, vector<2x128xf32> -> vector<2x128xf32>
    %247 = arith.index_cast %c6_i32 : i32 to index
    %c0_141 = arith.constant 0 : index
    %c0_142 = arith.constant 0 : index
    %248 = vector.load %arg9[%247, %c0_141, %c0_142] : memref<9x2x128xf32, #tpu.memory_space<vmem>>, vector<1x2x128xf32>
    %249 = vector.shape_cast %248 : vector<1x2x128xf32> to vector<2x128xf32>
    %250 = arith.addf %246, %249 : vector<2x128xf32>
    %cst_143 = arith.constant 0.000000e+00 : f32
    %251 = vector.broadcast %cst_143 : f32 to vector<2x128xf32>
    %252 = arith.subf %251, %250 : vector<2x128xf32>
    %253 = math.exp %252 : vector<2x128xf32>
    %cst_144 = arith.constant 1.000000e+00 : f32
    %254 = vector.broadcast %cst_144 : f32 to vector<2x128xf32>
    %255 = arith.addf %254, %253 : vector<2x128xf32>
    %cst_145 = arith.constant 1.000000e+00 : f32
    %256 = vector.broadcast %cst_145 : f32 to vector<2x128xf32>
    %257 = arith.divf %256, %255 : vector<2x128xf32>
    %258 = math.tanh %250 : vector<2x128xf32>
    %259 = vector.extract_strided_slice %257 {offsets = [0, 0], sizes = [2, 32], strides = [1, 1]} : vector<2x128xf32> to vector<2x32xf32>
    %260 = vector.extract_strided_slice %257 {offsets = [0, 32], sizes = [2, 32], strides = [1, 1]} : vector<2x128xf32> to vector<2x32xf32>
    %261 = vector.extract_strided_slice %258 {offsets = [0, 64], sizes = [2, 32], strides = [1, 1]} : vector<2x128xf32> to vector<2x32xf32>
    %262 = vector.extract_strided_slice %257 {offsets = [0, 96], sizes = [2, 32], strides = [1, 1]} : vector<2x128xf32> to vector<2x32xf32>
    %263 = arith.mulf %260, %242 : vector<2x32xf32>
    %264 = arith.mulf %259, %261 : vector<2x32xf32>
    %265 = arith.addf %263, %264 : vector<2x32xf32>
    %266 = math.tanh %265 : vector<2x32xf32>
    %267 = arith.mulf %262, %266 : vector<2x32xf32>
    %c7_i32 = arith.constant 7 : i32
    %c0_146 = arith.constant 0 : index
    %c0_147 = arith.constant 0 : index
    %268 = vector.load %arg5[%c0_146, %c0_147] : memref<32x128xf32, #tpu.memory_space<vmem>>, vector<32x128xf32>
    %cst_148 = arith.constant dense<0.000000e+00> : vector<2x128xf32>
    %269 = tpu.matmul %267, %268, %cst_148 {dimension_numbers = #tpu.dot_dimension_numbers<[1], [0], [0], [1], [0, 0, 1, 1], [], []>} : vector<2x32xf32>, vector<32x128xf32>, vector<2x128xf32> -> vector<2x128xf32>
    %270 = arith.index_cast %c7_i32 : i32 to index
    %c0_149 = arith.constant 0 : index
    %c0_150 = arith.constant 0 : index
    %271 = vector.load %arg9[%270, %c0_149, %c0_150] : memref<9x2x128xf32, #tpu.memory_space<vmem>>, vector<1x2x128xf32>
    %272 = vector.shape_cast %271 : vector<1x2x128xf32> to vector<2x128xf32>
    %273 = arith.addf %269, %272 : vector<2x128xf32>
    %cst_151 = arith.constant 0.000000e+00 : f32
    %274 = vector.broadcast %cst_151 : f32 to vector<2x128xf32>
    %275 = arith.subf %274, %273 : vector<2x128xf32>
    %276 = math.exp %275 : vector<2x128xf32>
    %cst_152 = arith.constant 1.000000e+00 : f32
    %277 = vector.broadcast %cst_152 : f32 to vector<2x128xf32>
    %278 = arith.addf %277, %276 : vector<2x128xf32>
    %cst_153 = arith.constant 1.000000e+00 : f32
    %279 = vector.broadcast %cst_153 : f32 to vector<2x128xf32>
    %280 = arith.divf %279, %278 : vector<2x128xf32>
    %281 = math.tanh %273 : vector<2x128xf32>
    %282 = vector.extract_strided_slice %280 {offsets = [0, 0], sizes = [2, 32], strides = [1, 1]} : vector<2x128xf32> to vector<2x32xf32>
    %283 = vector.extract_strided_slice %280 {offsets = [0, 32], sizes = [2, 32], strides = [1, 1]} : vector<2x128xf32> to vector<2x32xf32>
    %284 = vector.extract_strided_slice %281 {offsets = [0, 64], sizes = [2, 32], strides = [1, 1]} : vector<2x128xf32> to vector<2x32xf32>
    %285 = vector.extract_strided_slice %280 {offsets = [0, 96], sizes = [2, 32], strides = [1, 1]} : vector<2x128xf32> to vector<2x32xf32>
    %286 = arith.mulf %283, %265 : vector<2x32xf32>
    %287 = arith.mulf %282, %284 : vector<2x32xf32>
    %288 = arith.addf %286, %287 : vector<2x32xf32>
    %289 = math.tanh %288 : vector<2x32xf32>
    %290 = arith.mulf %285, %289 : vector<2x32xf32>
    %c8_i32 = arith.constant 8 : i32
    %c0_154 = arith.constant 0 : index
    %c0_155 = arith.constant 0 : index
    %291 = vector.load %arg5[%c0_154, %c0_155] : memref<32x128xf32, #tpu.memory_space<vmem>>, vector<32x128xf32>
    %cst_156 = arith.constant dense<0.000000e+00> : vector<2x128xf32>
    %292 = tpu.matmul %290, %291, %cst_156 {dimension_numbers = #tpu.dot_dimension_numbers<[1], [0], [0], [1], [0, 0, 1, 1], [], []>} : vector<2x32xf32>, vector<32x128xf32>, vector<2x128xf32> -> vector<2x128xf32>
    %293 = arith.index_cast %c8_i32 : i32 to index
    %c0_157 = arith.constant 0 : index
    %c0_158 = arith.constant 0 : index
    %294 = vector.load %arg9[%293, %c0_157, %c0_158] : memref<9x2x128xf32, #tpu.memory_space<vmem>>, vector<1x2x128xf32>
    %295 = vector.shape_cast %294 : vector<1x2x128xf32> to vector<2x128xf32>
    %296 = arith.addf %292, %295 : vector<2x128xf32>
    %cst_159 = arith.constant 0.000000e+00 : f32
    %297 = vector.broadcast %cst_159 : f32 to vector<2x128xf32>
    %298 = arith.subf %297, %296 : vector<2x128xf32>
    %299 = math.exp %298 : vector<2x128xf32>
    %cst_160 = arith.constant 1.000000e+00 : f32
    %300 = vector.broadcast %cst_160 : f32 to vector<2x128xf32>
    %301 = arith.addf %300, %299 : vector<2x128xf32>
    %cst_161 = arith.constant 1.000000e+00 : f32
    %302 = vector.broadcast %cst_161 : f32 to vector<2x128xf32>
    %303 = arith.divf %302, %301 : vector<2x128xf32>
    %304 = math.tanh %296 : vector<2x128xf32>
    %305 = vector.extract_strided_slice %303 {offsets = [0, 0], sizes = [2, 32], strides = [1, 1]} : vector<2x128xf32> to vector<2x32xf32>
    %306 = vector.extract_strided_slice %303 {offsets = [0, 32], sizes = [2, 32], strides = [1, 1]} : vector<2x128xf32> to vector<2x32xf32>
    %307 = vector.extract_strided_slice %304 {offsets = [0, 64], sizes = [2, 32], strides = [1, 1]} : vector<2x128xf32> to vector<2x32xf32>
    %308 = vector.extract_strided_slice %303 {offsets = [0, 96], sizes = [2, 32], strides = [1, 1]} : vector<2x128xf32> to vector<2x32xf32>
    %309 = arith.mulf %306, %288 : vector<2x32xf32>
    %310 = arith.mulf %305, %307 : vector<2x32xf32>
    %311 = arith.addf %309, %310 : vector<2x32xf32>
    %312 = math.tanh %311 : vector<2x32xf32>
    %313 = arith.mulf %308, %312 : vector<2x32xf32>
    %c9_i32 = arith.constant 9 : i32
    %c0_162 = arith.constant 0 : index
    %c0_163 = arith.constant 0 : index
    %314 = vector.load %arg6[%c0_162, %c0_163] : memref<32x128xf32, #tpu.memory_space<vmem>>, vector<32x128xf32>
    %cst_164 = arith.constant dense<0.000000e+00> : vector<2x128xf32>
    %315 = tpu.matmul %313, %314, %cst_164 {dimension_numbers = #tpu.dot_dimension_numbers<[1], [0], [0], [1], [0, 0, 1, 1], [], []>} : vector<2x32xf32>, vector<32x128xf32>, vector<2x128xf32> -> vector<2x128xf32>
    %c0_165 = arith.constant 0 : index
    %c0_166 = arith.constant 0 : index
    %316 = vector.load %arg7[%c0_165, %c0_166] : memref<1x128xf32, #tpu.memory_space<vmem>>, vector<1x128xf32>
    %317 = vector.broadcast %316 : vector<1x128xf32> to vector<2x128xf32>
    %318 = arith.addf %315, %317 : vector<2x128xf32>
    %c0_167 = arith.constant 0 : index
    %c0_168 = arith.constant 0 : index
    %319 = vector.load %arg8[%c0_167, %c0_168] : memref<2x128xf32, #tpu.memory_space<vmem>>, vector<2x128xf32>
    tpu.vector_store %arg8[%c0_167, %c0_168], %318 {strides = array<i32>} : memref<2x128xf32, #tpu.memory_space<vmem>>, vector<2x128xf32>,
    return
  }
}

</mosaic_0001>

<bundles_post_ra>
// kernel: tpu_custom_call.1
= control target key start
LH: loop header
LB: loop body
LE: loop exit
PB: predicated region body
PF: predicated region fallthrough
CT: control target
= control target key end

     0   :  { %13 = vsyncpa [#allocation6], 0  ;;  %s2035_s0 = inlined_call_operand.hbm [shape: s32[2,8], index: 0, kind: input, shape index: {}]   ;;  %s2036_s1 = inlined_call_operand.hbm [shape: f32[2,32], index: 1, kind: input, shape index: {}]   ;;  %s2037_s2 = inlined_call_operand.hbm [shape: f32[32,128], index: 2, kind: input, shape index: {}]   ;;  %s2038_s3 = inlined_call_operand.vmem [shape: f32[1,128], index: 3, kind: input, shape index: {}]   ;;  %s2039_s4 = inlined_call_operand.hbm [shape: f32[40,1,128], index: 4, kind: input, shape index: {}]   ;;  %s2040_s5 = inlined_call_operand.hbm [shape: f32[32,128], index: 5, kind: input, shape index: {}]   ;;  %s2041_s6 = inlined_call_operand.hbm [shape: f32[32,128], index: 6, kind: input, shape index: {}]   ;;  %s2042_s7 = inlined_call_operand.vmem [shape: f32[1,128], index: 7, kind: input, shape index: {}]   ;;  %s2043_s8 = inlined_call_operand.hbm [shape: f32[2,128], index: 8, kind: output, shape index: {}]  }
   0x1   :  { %14 = vsyncpa [#allocation4], 0 }
   0x2   :  { %15 = vsyncpa [#allocation9], 0 }
   0x3   :  { %16 = vsyncpa [#allocation12], 0 }
   0x4   :  { %17 = vsyncpa [#allocation5], 0  ;;  %s1774_s27 = smov [#allocation8]  }
   0x5   :  { %s41_s28 = sshll.u32 %s1774_s27, 4  ;;  %s42_s28 = int_to_ptr.vmem [resolvable:$true] %s41_s28 }
   0x6   :  { %s1644_s29 = scalar_lea.vmem %s42_s28, 512  ;;  %p1649_p1 = scmp.lt.s32.totalorder %s42_s28, %s42_s28 }
   0x7   :  { %p1645_p0 = scmp.ne.s32.totalorder %s42_s28, %s1644_s29  ;;  %p1650_p2 = scmp.lt.s32.totalorder %s1644_s29, %s1644_s29 }
   0x9   :  { %p1651_p3 = por %p1650_p2, %p1649_p1 }
   0xb   :  { %p1652_p4 = pnand %p1651_p3, %p1645_p0 }
   0xd   :  { %1655 = shalt.err (!%p1652_p4)
}
   0xe   :  { %s1775_s30 = smov 128   ;;  %s1776_s9 = smov 8  }
   0xf   :  { %47 = dma.hbm_to_vmem [thread:$0]  %s2037_s2, 512, %s42_s28, [#allocation9], %s1775_s30, %s1775_s30, %s1776_s9  }
  0x10   :  { %s1777_s12 = smov [#allocation11]  }
  0x11   :  { %s67_s13 = sshll.u32 %s1777_s12, 4  ;;  %s68_s13 = int_to_ptr.vmem [resolvable:$true] %s67_s13 }
  0x12   :  { %s1664_s14 = scalar_lea.vmem %s68_s13, 512  ;;  %p1669_p6 = scmp.lt.s32.totalorder %s68_s13, %s68_s13 }
  0x13   :  { %p1665_p5 = scmp.ne.s32.totalorder %s68_s13, %s1664_s14  ;;  %p1670_p7 = scmp.lt.s32.totalorder %s1664_s14, %s1664_s14 }
  0x15   :  { %p1671_p8 = por %p1670_p7, %p1669_p6 }
  0x17   :  { %p1672_p9 = pnand %p1671_p8, %p1665_p5 }
  0x19   :  { %1675 = shalt.err (!%p1672_p9)
}
  0x1a   :  { %73 = dma.hbm_to_vmem [thread:$0]  %s2040_s5, 512, %s68_s13, [#allocation12], %s1775_s30, %s1775_s30, %s1776_s9  }
  0x1b   :  { %s1778_s17 = smov [#allocation3]   ;;  %s1779_s19 = smov [#allocation7]  }
  0x1c   :  { %25 = dma.hbm_to_smem %s2035_s0, 32, %s1778_s17, [#allocation6]  }
  0x1d   :  { %s32_s20 = sshll.u32 %s1779_s19, 4  ;;  %s1780_s21 = smov [#allocation10]   ;;  %s33_s20 = int_to_ptr.vmem [resolvable:$true] %s32_s20 }
  0x1e   :  { %s55_s22 = sshll.u32 %s1780_s21, 4  ;;  %s1692_s23 = scalar_lea.vmem %s33_s20, 32  ;;  %s56_s22 = int_to_ptr.vmem [resolvable:$true] %s55_s22 }
  0x1f   :  { %p1693_p10 = scmp.ne.s32.totalorder %s33_s20, %s1692_s23  ;;  %p1697_p11 = scmp.lt.s32.totalorder %s33_s20, %s33_s20 }
  0x20   :  { %p1698_p12 = scmp.lt.s32.totalorder %s1692_s23, %s1692_s23 }
  0x22   :  { %p1699_p13 = por %p1698_p12, %p1697_p11 }
  0x24   :  { %p1700_p0 = pnand %p1699_p13, %p1693_p10 }
  0x26   :  { %1703 = shalt.err (!%p1700_p0)
}
  0x27   :  { %35 = dma.hbm_to_vmem [thread:$0]  %s2036_s1, 32, %s33_s20, [#allocation4]  }
  0x28   :  { %s1712_s5 = scalar_lea.vmem %s56_s22, 640  ;;  %p1717_p2 = scmp.lt.s32.totalorder %s56_s22, %s56_s22 }
  0x29   :  { %p1713_p1 = scmp.ne.s32.totalorder %s56_s22, %s1712_s5  ;;  %p1718_p3 = scmp.lt.s32.totalorder %s1712_s5, %s1712_s5 }
  0x2b   :  { %p1719_p4 = por %p1718_p3, %p1717_p2 }
  0x2d   :  { %p1720_p5 = pnand %p1719_p4, %p1713_p1 }
  0x2f   :  { %1723 = shalt.err (!%p1720_p5)
}
  0x30   :  { %s1781_s0 = smov 16   ;;  %s1782_s26 = smov 1  }
  0x31   :  { %61 = dma.hbm_to_vmem [thread:$0]  %s2039_s4, 640, %s56_s22, [#allocation9], %s1781_s0, %s1781_s0, %s1782_s26  }
  0x32   :  { %s1783_s29 = smov [#allocation13]  }
  0x33   :  { %s79_s10 = sshll.u32 %s1783_s29, 4  ;;  %s80_s10 = int_to_ptr.vmem [resolvable:$true] %s79_s10 }
  0x34   :  { %s1732_s11 = scalar_lea.vmem %s80_s10, 512  ;;  %p1737_p7 = scmp.lt.s32.totalorder %s80_s10, %s80_s10 }
  0x35   :  { %p1733_p6 = scmp.ne.s32.totalorder %s80_s10, %s1732_s11  ;;  %p1738_p8 = scmp.lt.s32.totalorder %s1732_s11, %s1732_s11 }
  0x37   :  { %p1739_p9 = por %p1738_p8, %p1737_p7 }
  0x39   :  { %p1740_p10 = pnand %p1739_p9, %p1733_p6 }
  0x3b   :  { %1743 = shalt.err (!%p1740_p10)
}
  0x3c   :  { %85 = dma.hbm_to_vmem [thread:$0]  %s2041_s6, 512, %s80_s10, [#allocation12], %s1775_s30, %s1775_s30, %s1776_s9  }
  0x3d   :  { %1764 = dma.done.wait [#allocation6], 32  }
  0x3e   :  { %1765 = vsyncadd [#allocation6], 4294967264 }
  0x3f   :  { %1766 = dma.done.wait [#allocation4], 32  }
  0x40   :  { %1767 = vsyncadd [#allocation4], 4294967264 }
  0x41   :  { %1768 = dma.done.wait [#allocation9], 1152  }
  0x42   :  { %1769 = vsyncadd [#allocation9], 4294966144 }
  0x43   :  { %1770 = dma.done.wait [#allocation12], 1024  }
  0x44   :  { %1771 = vsyncadd [#allocation12], 4294966272 }
  0x45   :  { %106 = sfence }
  0x46   :  { %v111_v0 = vld [vmem:[#allocation8 + $0x18] sm:$0xff]  ;;  %v1784_v1 = vmov 0.0   ;;  %v110_v2 = vld [vmem:[#allocation8 + $0x10] sm:$0xff]  ;;  %vm1785_vm0 = vmmov 0   ;;  %v1864_v3 = vld [vmem:[#allocation11 + $0x18] sm:$0xff]  ;;  %vm119_vm1 = vcmask 261120  }
  0x47   :  { %1428 = vmatprep.subr.mxu0 %v1784_v1  ;;  %1436 = vmatprep.mubr.msk.f32.mxu0 %vm1785_vm0, %v1784_v1  ;;  %v1867_v4 = vld [vmem:[#allocation11 + $0x10] sm:$0xff]  ;;  %v109_v5 = vld [vmem:[#allocation8 + $0x8] sm:$0xff]  ;;  %v1872_v6 = vld [vmem:[#allocation11 + $0x8] sm:$0xff]  ;;  %s1786_s30 = smov 64   ;;  %s194_s9 = sld [smem:[#allocation3]]  ;;  %vm206_vm2 = vcmask 1040384  }
  0x48   :  { %1429 = vmatpush3.msra.mxu0 %v111_v0  ;;  %1439 = vmatprep.subr.mxu1 %v1784_v1  ;;  %v108_v7 = vld [vmem:[#allocation8] sm:$0xff]  ;;  %v107_v8 = vld [vmem:[#allocation7] sm:$0x3]  ;;  %v1877_v9 = vld [vmem:[#allocation11] sm:$0xff]  ;;  %s1340_s13 = sld [smem:[#allocation3 + $0x80]] }
  0x49   :  { %1430 = vmatprep.subr.mxu0 %v1784_v1  ;;  %1440 = vmatpush3.msra.mxu1 %v1864_v3  ;;  %v1338_v10 = vld [vmem:[%s2038_s3] ss:$0 sm:$0xff]  ;;  %s1787_s3 = smov 32   ;;  %s1342_s16 = sld [smem:[#allocation3 + $0x1]] }
  0x4a   :  { %1431 = vmatpush3.msra.mxu0 %v110_v2  ;;  %1441 = vmatprep.subr.mxu1 %v1784_v1  ;;  %s1343_s17 = sld [smem:[#allocation3 + $0x81]] }
  0x4b   :  { %1432 = vmatprep.subr.mxu0 %v1784_v1  ;;  %1442 = vmatpush3.msra.mxu1 %v1867_v4  ;;  %s1345_s19 = sld [smem:[#allocation3 + $0x2]] }
  0x4c   :  { %1433 = vmatpush3.msra.mxu0 %v109_v5  ;;  %1443 = vmatprep.subr.mxu1 %v1784_v1  ;;  %s1346_s20 = sld [smem:[#allocation3 + $0x82]] }
  0x4d   :  { %1434 = vmatprep.subr.mxu0 %v1784_v1  ;;  %1444 = vmatpush3.msra.mxu1 %v1872_v6  ;;  %s195_s14 = scalar_lea.vmem [#allocation10], %s194_s9  ;;  %s1348_s23 = sld [smem:[#allocation3 + $0x3]] }
  0x4e   :  { %1435 = vmatpush3.msra.mxu0 %v108_v7  ;;  %1445 = vmatprep.subr.mxu1 %v1784_v1  ;;  %v196_v30 = vld [vmem:[%s195_s14] sm:$0x1]  ;;  %s198_s15 = scalar_lea.vmem [#allocation10], %s1340_s13  ;;  %s1349_s24 = sld [smem:[#allocation3 + $0x83]] }
  0x4f   :  { %1437 = vmatmul.mubr.msk.f32.vlgmr.msra.gmra.mxu0 %vm119_vm1, %v107_v8  ;;  %1446 = vmatpush3.msra.mxu1 %v1877_v9  ;;  %v1341_v31 = vld [vmem:[%s198_s15] ss:$0 sm:$0xff]  ;;  %s211_s18 = scalar_lea.vmem [#allocation10], %s1342_s16  ;;  %s1351_s0 = sld [smem:[#allocation3 + $0x4]] }
  0x50   :  { %1447 = vmatprep.mubr.msk.f32.mxu1 %vm1785_vm0, %v1784_v1  ;;  %1450 = vmatprep.subr.mxu0 %v1784_v1  ;;  %v207_v32 = vsel %vm206_vm2, %v196_v30, %v1341_v31  ;;  %v212_v52 = vld [vmem:[%s211_s18] sm:$0x1]  ;;  %s214_s2 = scalar_lea.vmem [#allocation10], %s1343_s17  ;;  %s1352_s26 = sld [smem:[#allocation3 + $0x84]] }
  0x51   :  { %1448 = vmatmul.mubr.f32.vlgmr.msra.gmra.mxu1 %v1784_v1  ;;  %1451 = vmatpush3.msra.mxu0 %v1864_v3  ;;  %209 = vst [vmem:[#allocation2 + $0x2] sm:$0x3] %v207_v32  ;;  %v1344_v53 = vld [vmem:[%s214_s2] ss:$0 sm:$0xff]  ;;  %s226_s21 = scalar_lea.vmem [#allocation10], %s1345_s19  ;;  %s1354_s29 = sld [smem:[#allocation3 + $0x5]] }
  0x52   :  { %1452 = vmatprep.subr.mxu0 %v1784_v1  ;;  %1458 = vmatprep.mubr.msk.f32.mxu0 %vm1785_vm0, %v1784_v1  ;;  %v222_v54 = vsel %vm206_vm2, %v212_v52, %v1344_v53  ;;  %s229_s22 = scalar_lea.vmem [#allocation10], %s1346_s20  ;;  %s1355_s10 = sld [smem:[#allocation3 + $0x85]] }
  0x53   :  { %1453 = vmatpush3.msra.mxu0 %v1867_v4  ;;  %1461 = vmatprep.subr.mxu1 %v1784_v1  ;;  %224 = vst [vmem:[#allocation2 + $0x4] sm:$0x3] %v222_v54  ;;  %s241_s25 = scalar_lea.vmem [#allocation10], %s1348_s23  ;;  %s1357_s12 = sld [smem:[#allocation3 + $0x6]] }
  0x54   :  { %1454 = vmatprep.subr.mxu0 %v1784_v1  ;;  %1462 = vmatpush3.msra.mxu1 %v1864_v3  ;;  %s244_s5 = scalar_lea.vmem [#allocation10], %s1349_s24  ;;  %s1358_s4 = sld [smem:[#allocation3 + $0x86]] }
  0x55   :  { %1455 = vmatpush3.msra.mxu0 %v1872_v6  ;;  %1463 = vmatprep.subr.mxu1 %v1784_v1  ;;  %s256_s27 = scalar_lea.vmem [#allocation10], %s1351_s0  ;;  %s1360_s13 = sld [smem:[#allocation3 + $0x7]] }
  0x56   :  { %1456 = vmatprep.subr.mxu0 %v1784_v1  ;;  %1464 = vmatpush3.msra.mxu1 %v1867_v4  ;;  %s259_s28 = scalar_lea.vmem [#allocation10], %s1352_s26  ;;  %s1361_s14 = sld [smem:[#allocation3 + $0x87]] }
  0x57   :  { %1457 = vmatpush3.msra.mxu0 %v1877_v9  ;;  %1465 = vmatprep.subr.mxu1 %v1784_v1  ;;  %s271_s11 = scalar_lea.vmem [#allocation10], %s1354_s29  ;;  %s1788_s2 = smov [#allocation14]  }
  0x58   :  { %1466 = vmatpush3.msra.mxu1 %v1872_v6  ;;  %1469 = vmatprep.mubr.msk.f32.mxu1 %vm1785_vm0, %v1784_v1  ;;  %v417_v36 = vld [vmem:[#allocation2 + $0x2] sm:$0x3]  ;;  %s274_s1 = scalar_lea.vmem [#allocation10], %s1355_s10  ;;  %s1310_s19 = sshll.u32 %s1788_s2, 4  ;;  %s1311_s19 = int_to_ptr.vmem [resolvable:$true] %s1310_s19 }
  0x59   :  { %1467 = vmatprep.subr.mxu1 %v1784_v1  ;;  %1472 = vmatprep.subr.mxu0 %v1784_v1  ;;  %s286_s6 = scalar_lea.vmem [#allocation10], %s1357_s12  ;;  %s1744_s20 = scalar_lea.vmem %s1311_s19, 32 }
  0x5a   :  { %1468 = vmatpush3.msra.mxu1 %v1877_v9  ;;  %v517_v58 = vld [vmem:[#allocation2 + $0x4] sm:$0x3]  ;;  %s289_s9 = scalar_lea.vmem [#allocation10], %s1358_s4  ;;  %p1745_p11 = scmp.ne.s32.totalorder %s1311_s19, %s1744_s20 }
  0x5b   :  { %1483 = vmatprep.subr.mxu1 %v1784_v1  ;;  %s301_s15 = scalar_lea.vmem [#allocation10], %s1360_s13  ;;  %p1749_p12 = scmp.lt.s32.totalorder %s1311_s19, %s1311_s19 }
  0x5c   :  { %s304_s16 = scalar_lea.vmem [#allocation10], %s1361_s14  ;;  %p1750_p13 = scmp.lt.s32.totalorder %s1744_s20, %s1744_s20 }
  0x5e   :  { %p1751_p0 = por %p1750_p13, %p1749_p12 }
  0x60   :  { %p1752_p1 = pnand %p1751_p0, %p1745_p11 }
 0x10f   :  { %v189_v11 = vpop.f32.mrf.mxu0 }
 0x110   :  { %v190_v12 = vadd.f32 %v1338_v10, %v189_v11 }
 0x111   :  { %v1438_v13 = vpop.f32.mrf.mxu0  ;;  %v389_v14 = vpop.f32.mrf.mxu1 }
 0x112   :  { %193 = vst [vmem:[#allocation2] sm:$0x3] %v190_v12 }
 0x113   :  { %v1449_v15 = vpop.f32.mrf.mxu1 }
 0x114   :  { %v227_v15 = vld [vmem:[%s226_s21] sm:$0x1] }
 0x119   :  { %v319_v16 = vld [vmem:[#allocation2] sm:$0x3] }
 0x11a   :  { %v390_v17 = vadd.f32 %v389_v14, %v319_v16  ;;  %v1347_v16 = vld [vmem:[%s229_s22] ss:$0 sm:$0xff] }
 0x11c   :  { %1564 = vtanh.f32 %v390_v17  ;;  %v393_v19 = vsub.f32 0.0, %v390_v17  ;;  %v237_v17 = vsel %vm206_vm2, %v227_v15, %v1347_v16 }
 0x11d   :  { %239 = vst [vmem:[#allocation2 + $0x6] sm:$0x3] %v237_v17 }
 0x11e   :  { %v394_v20 = vmul.f32 1.442695, %v393_v19 }
 0x120   :  { %1566 = vpow2.f32 %v394_v20 }
 0x129   :  { %v1565_v18 = vpop.eup %1564 }
 0x12a   :  { %402 = vrot.lane.b32.xlu0 %v1565_v18, %s1786_s30 }
 0x12d   :  { %v1567_v21 = vpop.eup %1566 }
 0x12e   :  { %v396_v22 = vadd.f32 1.0, %v1567_v21  ;;  %v617_v21 = vld [vmem:[#allocation2 + $0x6] sm:$0x3] }
 0x130   :  { %1568 = vrcp.f32 %v396_v22 }
 0x13d   :  { %v1569_v23 = vpop.eup %1568 }
 0x13e   :  { %v400_v26 = vmul.f32 0.0, %v1569_v23 }
 0x19c   :  { %v403_v24 = vpop.permute.xlu0 %402 }
 0x19d   :  { %v405_v25 = vmul.f32 %v1569_v23, %v403_v24 }
 0x19f   :  { %407 = vrot.lane.b32.xlu0 %v405_v25, %s1787_s3 }
 0x211   :  { %v408_v27 = vpop.permute.xlu0 %407 }
 0x212   :  { %v410_v28 = vadd.f32 %v408_v27, %v400_v26 }
 0x214   :  { %1570 = vtanh.f32 %v410_v28 }
 0x221   :  { %v1571_v29 = vpop.eup %1570 }
 0x222   :  { %413 = vrot.lane.b32.xlu1 %v1571_v29, %s1786_s30 }
 0x294   :  { %v414_v33 = vpop.permute.xlu1 %413 }
 0x295   :  { %v416_v34 = vmul.f32 %v1569_v23, %v414_v33 }
 0x297   :  { %419 = vrot.lane.b32.xlu1 %v416_v34, %s1787_s3 }
 0x309   :  { %v420_v35 = vpop.permute.xlu1 %419 }
 0x30a   :  { %1459 = vmatmul.mubr.msk.f32.vlgmr.msra.gmra.mxu0 %vm119_vm1, %v420_v35 }
 0x30b   :  { %1473 = vmatpush3.msra.mxu0 %v1864_v3  ;;  %1480 = vmatprep.mubr.msk.f32.mxu0 %vm1785_vm0, %v1784_v1 }
 0x30c   :  { %1474 = vmatprep.subr.mxu0 %v1784_v1 }
 0x30d   :  { %1475 = vmatpush3.msra.mxu0 %v1867_v4 }
 0x30e   :  { %1476 = vmatprep.subr.mxu0 %v1784_v1 }
 0x30f   :  { %1477 = vmatpush3.msra.mxu0 %v1872_v6 }
 0x310   :  { %1478 = vmatprep.subr.mxu0 %v1784_v1 }
 0x311   :  { %1479 = vmatpush3.msra.mxu0 %v1877_v9 }
 0x312   :  { %1494 = vmatprep.subr.mxu0 %v1784_v1 }
 0x3ca   :  { %v489_v37 = vpop.f32.mrf.mxu0 }
 0x3cb   :  { %v490_v38 = vadd.f32 %v489_v37, %v417_v36  ;;  %v242_v37 = vld [vmem:[%s241_s25] sm:$0x1] }
 0x3cc   :  { %v1460_v39 = vpop.f32.mrf.mxu0 }
 0x3cd   :  { %1572 = vtanh.f32 %v490_v38  ;;  %v493_v41 = vsub.f32 0.0, %v490_v38  ;;  %v1350_v38 = vld [vmem:[%s244_s5] ss:$0 sm:$0xff] }
 0x3ce   :  { %v252_v39 = vsel %vm206_vm2, %v242_v37, %v1350_v38 }
 0x3cf   :  { %v494_v42 = vmul.f32 1.442695, %v493_v41  ;;  %254 = vst [vmem:[#allocation2 + $0x8] sm:$0x3] %v252_v39 }
 0x3d1   :  { %1574 = vpow2.f32 %v494_v42 }
 0x3da   :  { %v1573_v40 = vpop.eup %1572 }
 0x3db   :  { %502 = vrot.lane.b32.xlu0 %v1573_v40, %s1786_s30 }
 0x3de   :  { %v1575_v43 = vpop.eup %1574 }
 0x3df   :  { %v496_v44 = vadd.f32 1.0, %v1575_v43  ;;  %v717_v43 = vld [vmem:[#allocation2 + $0x8] sm:$0x3] }
 0x3e1   :  { %1576 = vrcp.f32 %v496_v44 }
 0x3ee   :  { %v1577_v45 = vpop.eup %1576 }
 0x3ef   :  { %v500_v48 = vmul.f32 %v1577_v45, %v410_v28 }
 0x44d   :  { %v503_v46 = vpop.permute.xlu0 %502 }
 0x44e   :  { %v505_v47 = vmul.f32 %v1577_v45, %v503_v46 }
 0x450   :  { %507 = vrot.lane.b32.xlu1 %v505_v47, %s1787_s3 }
 0x4c2   :  { %v508_v49 = vpop.permute.xlu1 %507 }
 0x4c3   :  { %v510_v50 = vadd.f32 %v508_v49, %v500_v48 }
 0x4c5   :  { %1578 = vtanh.f32 %v510_v50 }
 0x4d2   :  { %v1579_v51 = vpop.eup %1578 }
 0x4d3   :  { %513 = vrot.lane.b32.xlu0 %v1579_v51, %s1786_s30 }
 0x545   :  { %v514_v55 = vpop.permute.xlu0 %513 }
 0x546   :  { %v516_v56 = vmul.f32 %v1577_v45, %v514_v55 }
 0x548   :  { %519 = vrot.lane.b32.xlu1 %v516_v56, %s1787_s3 }
 0x5ba   :  { %v520_v57 = vpop.permute.xlu1 %519 }
 0x5bb   :  { %1470 = vmatmul.mubr.msk.f32.vlgmr.msra.gmra.mxu1 %vm119_vm1, %v520_v57 }
 0x5bc   :  { %1484 = vmatpush3.msra.mxu1 %v1864_v3  ;;  %1491 = vmatprep.mubr.msk.f32.mxu1 %vm1785_vm0, %v1784_v1 }
 0x5bd   :  { %1485 = vmatprep.subr.mxu1 %v1784_v1 }
 0x5be   :  { %1486 = vmatpush3.msra.mxu1 %v1867_v4 }
 0x5bf   :  { %1487 = vmatprep.subr.mxu1 %v1784_v1 }
 0x5c0   :  { %1488 = vmatpush3.msra.mxu1 %v1872_v6 }
 0x5c1   :  { %1489 = vmatprep.subr.mxu1 %v1784_v1 }
 0x5c2   :  { %1490 = vmatpush3.msra.mxu1 %v1877_v9 }
 0x5c3   :  { %1505 = vmatprep.subr.mxu1 %v1784_v1 }
 0x67b   :  { %v589_v59 = vpop.f32.mrf.mxu1 }
 0x67c   :  { %v590_v60 = vadd.f32 %v589_v59, %v517_v58  ;;  %v257_v59 = vld [vmem:[%s256_s27] sm:$0x1] }
 0x67d   :  { %v1471_v61 = vpop.f32.mrf.mxu1 }
 0x67e   :  { %1580 = vtanh.f32 %v590_v60  ;;  %v593_v63 = vsub.f32 0.0, %v590_v60  ;;  %v1353_v60 = vld [vmem:[%s259_s28] ss:$0 sm:$0xff] }
 0x67f   :  { %v267_v61 = vsel %vm206_vm2, %v257_v59, %v1353_v60 }
 0x680   :  { %v594_v0 = vmul.f32 1.442695, %v593_v63  ;;  %269 = vst [vmem:[#allocation2 + $0xa] sm:$0x3] %v267_v61 }
 0x682   :  { %1582 = vpow2.f32 %v594_v0 }
 0x68b   :  { %v1581_v62 = vpop.eup %1580 }
 0x68c   :  { %602 = vrot.lane.b32.xlu0 %v1581_v62, %s1786_s30 }
 0x68f   :  { %v1583_v2 = vpop.eup %1582 }
 0x690   :  { %v596_v5 = vadd.f32 1.0, %v1583_v2  ;;  %v817_v2 = vld [vmem:[#allocation2 + $0xa] sm:$0x3] }
 0x692   :  { %1584 = vrcp.f32 %v596_v5 }
 0x69f   :  { %v1585_v7 = vpop.eup %1584 }
 0x6a0   :  { %v600_v11 = vmul.f32 %v1585_v7, %v510_v50 }
 0x6fe   :  { %v603_v8 = vpop.permute.xlu0 %602 }
 0x6ff   :  { %v605_v10 = vmul.f32 %v1585_v7, %v603_v8 }
 0x701   :  { %607 = vrot.lane.b32.xlu1 %v605_v10, %s1787_s3 }
 0x773   :  { %v608_v12 = vpop.permute.xlu1 %607 }
 0x774   :  { %v610_v13 = vadd.f32 %v608_v12, %v600_v11 }
 0x776   :  { %1586 = vtanh.f32 %v610_v13 }
 0x783   :  { %v1587_v14 = vpop.eup %1586 }
 0x784   :  { %613 = vrot.lane.b32.xlu0 %v1587_v14, %s1786_s30 }
 0x7f6   :  { %v614_v18 = vpop.permute.xlu0 %613 }
 0x7f7   :  { %v616_v19 = vmul.f32 %v1585_v7, %v614_v18 }
 0x7f9   :  { %619 = vrot.lane.b32.xlu1 %v616_v19, %s1787_s3 }
 0x86b   :  { %v620_v20 = vpop.permute.xlu1 %619 }
 0x86c   :  { %1481 = vmatmul.mubr.msk.f32.vlgmr.msra.gmra.mxu0 %vm119_vm1, %v620_v20 }
 0x86d   :  { %1495 = vmatpush3.msra.mxu0 %v1864_v3  ;;  %1502 = vmatprep.mubr.msk.f32.mxu0 %vm1785_vm0, %v1784_v1 }
 0x86e   :  { %1496 = vmatprep.subr.mxu0 %v1784_v1 }
 0x86f   :  { %1497 = vmatpush3.msra.mxu0 %v1867_v4 }
 0x870   :  { %1498 = vmatprep.subr.mxu0 %v1784_v1 }
 0x871   :  { %1499 = vmatpush3.msra.mxu0 %v1872_v6 }
 0x872   :  { %1500 = vmatprep.subr.mxu0 %v1784_v1 }
 0x873   :  { %1501 = vmatpush3.msra.mxu0 %v1877_v9 }
 0x874   :  { %1516 = vmatprep.subr.mxu0 %v1784_v1 }
 0x92c   :  { %v689_v22 = vpop.f32.mrf.mxu0 }
 0x92d   :  { %v690_v23 = vadd.f32 %v689_v22, %v617_v21  ;;  %v272_v22 = vld [vmem:[%s271_s11] sm:$0x1] }
 0x92e   :  { %v1482_v24 = vpop.f32.mrf.mxu0 }
 0x92f   :  { %1588 = vtanh.f32 %v690_v23  ;;  %v693_v26 = vsub.f32 0.0, %v690_v23  ;;  %v1356_v23 = vld [vmem:[%s274_s1] ss:$0 sm:$0xff] }
 0x930   :  { %v282_v24 = vsel %vm206_vm2, %v272_v22, %v1356_v23 }
 0x931   :  { %v694_v27 = vmul.f32 1.442695, %v693_v26  ;;  %284 = vst [vmem:[#allocation2 + $0xc] sm:$0x3] %v282_v24  ;;  %v1220_v24 = vld [vmem:[#allocation13 + $0x18] sm:$0xff] }
 0x933   :  { %1590 = vpow2.f32 %v694_v27 }
 0x93c   :  { %v1589_v25 = vpop.eup %1588 }
 0x93d   :  { %702 = vrot.lane.b32.xlu0 %v1589_v25, %s1786_s30 }
 0x940   :  { %v1591_v28 = vpop.eup %1590 }
 0x941   :  { %v696_v29 = vadd.f32 1.0, %v1591_v28  ;;  %v917_v28 = vld [vmem:[#allocation2 + $0xc] sm:$0x3] }
 0x943   :  { %1592 = vrcp.f32 %v696_v29 }
 0x950   :  { %v1593_v30 = vpop.eup %1592 }
 0x951   :  { %v700_v33 = vmul.f32 %v1593_v30, %v610_v13 }
 0x9af   :  { %v703_v31 = vpop.permute.xlu0 %702 }
 0x9b0   :  { %v705_v32 = vmul.f32 %v1593_v30, %v703_v31 }
 0x9b2   :  { %707 = vrot.lane.b32.xlu1 %v705_v32, %s1787_s3 }
 0xa24   :  { %v708_v34 = vpop.permute.xlu1 %707 }
 0xa25   :  { %v710_v35 = vadd.f32 %v708_v34, %v700_v33 }
 0xa27   :  { %1594 = vtanh.f32 %v710_v35 }
 0xa34   :  { %v1595_v36 = vpop.eup %1594 }
 0xa35   :  { %713 = vrot.lane.b32.xlu0 %v1595_v36, %s1786_s30 }
 0xaa7   :  { %v714_v40 = vpop.permute.xlu0 %713 }
 0xaa8   :  { %v716_v41 = vmul.f32 %v1593_v30, %v714_v40  ;;  %v287_v40 = vld [vmem:[%s286_s6] sm:$0x1] }
 0xaaa   :  { %719 = vrot.lane.b32.xlu1 %v716_v41, %s1787_s3  ;;  %v1359_v41 = vld [vmem:[%s289_s9] ss:$0 sm:$0xff] }
 0xb1c   :  { %v720_v42 = vpop.permute.xlu1 %719 }
 0xb1d   :  { %1492 = vmatmul.mubr.msk.f32.vlgmr.msra.gmra.mxu1 %vm119_vm1, %v720_v42  ;;  %v297_v42 = vsel %vm206_vm2, %v287_v40, %v1359_v41 }
 0xb1e   :  { %1506 = vmatpush3.msra.mxu1 %v1864_v3  ;;  %1513 = vmatprep.mubr.msk.f32.mxu1 %vm1785_vm0, %v1784_v1  ;;  %299 = vst [vmem:[#allocation2 + $0xe] sm:$0x3] %v297_v42 }
 0xb1f   :  { %1507 = vmatprep.subr.mxu1 %v1784_v1 }
 0xb20   :  { %1508 = vmatpush3.msra.mxu1 %v1867_v4 }
 0xb21   :  { %1509 = vmatprep.subr.mxu1 %v1784_v1 }
 0xb22   :  { %1510 = vmatpush3.msra.mxu1 %v1872_v6 }
 0xb23   :  { %1511 = vmatprep.subr.mxu1 %v1784_v1 }
 0xb24   :  { %1512 = vmatpush3.msra.mxu1 %v1877_v9 }
 0xb25   :  { %1527 = vmatprep.subr.mxu1 %v1784_v1 }
 0xbdd   :  { %v789_v44 = vpop.f32.mrf.mxu1 }
 0xbde   :  { %v790_v45 = vadd.f32 %v789_v44, %v717_v43 }
 0xbdf   :  { %v1493_v46 = vpop.f32.mrf.mxu1 }
 0xbe0   :  { %1596 = vtanh.f32 %v790_v45  ;;  %v793_v48 = vsub.f32 0.0, %v790_v45  ;;  %v1017_v46 = vld [vmem:[#allocation2 + $0xe] sm:$0x3] }
 0xbe2   :  { %v794_v49 = vmul.f32 1.442695, %v793_v48 }
 0xbe4   :  { %1598 = vpow2.f32 %v794_v49 }
 0xbed   :  { %v1597_v47 = vpop.eup %1596 }
 0xbee   :  { %802 = vrot.lane.b32.xlu0 %v1597_v47, %s1786_s30 }
 0xbf1   :  { %v1599_v50 = vpop.eup %1598 }
 0xbf2   :  { %v796_v51 = vadd.f32 1.0, %v1599_v50 }
 0xbf4   :  { %1600 = vrcp.f32 %v796_v51 }
 0xc01   :  { %v1601_v52 = vpop.eup %1600 }
 0xc02   :  { %v800_v55 = vmul.f32 %v1601_v52, %v710_v35 }
 0xc60   :  { %v803_v53 = vpop.permute.xlu0 %802 }
 0xc61   :  { %v805_v54 = vmul.f32 %v1601_v52, %v803_v53 }
 0xc63   :  { %807 = vrot.lane.b32.xlu1 %v805_v54, %s1787_s3 }
 0xcd5   :  { %v808_v56 = vpop.permute.xlu1 %807 }
 0xcd6   :  { %v810_v57 = vadd.f32 %v808_v56, %v800_v55 }
 0xcd8   :  { %1602 = vtanh.f32 %v810_v57 }
 0xce5   :  { %v1603_v58 = vpop.eup %1602 }
 0xce6   :  { %813 = vrot.lane.b32.xlu0 %v1603_v58, %s1786_s30 }
 0xd58   :  { %v814_v62 = vpop.permute.xlu0 %813 }
 0xd59   :  { %v816_v63 = vmul.f32 %v1601_v52, %v814_v62  ;;  %v302_v62 = vld [vmem:[%s301_s15] sm:$0x1] }
 0xd5b   :  { %819 = vrot.lane.b32.xlu1 %v816_v63, %s1787_s3  ;;  %v1362_v63 = vld [vmem:[%s304_s16] ss:$0 sm:$0xff] }
 0xdcd   :  { %v820_v0 = vpop.permute.xlu1 %819 }
 0xdce   :  { %1503 = vmatmul.mubr.msk.f32.vlgmr.msra.gmra.mxu0 %vm119_vm1, %v820_v0  ;;  %v312_v0 = vsel %vm206_vm2, %v302_v62, %v1362_v63 }
 0xdcf   :  { %1517 = vmatpush3.msra.mxu0 %v1864_v3  ;;  %1524 = vmatprep.mubr.msk.f32.mxu0 %vm1785_vm0, %v1784_v1  ;;  %314 = vst [vmem:[#allocation2 + $0x10] sm:$0x3] %v312_v0 }
 0xdd0   :  { %1518 = vmatprep.subr.mxu0 %v1784_v1 }
 0xdd1   :  { %1519 = vmatpush3.msra.mxu0 %v1867_v4 }
 0xdd2   :  { %1520 = vmatprep.subr.mxu0 %v1784_v1 }
 0xdd3   :  { %1521 = vmatpush3.msra.mxu0 %v1872_v6 }
 0xdd4   :  { %1522 = vmatprep.subr.mxu0 %v1784_v1 }
 0xdd5   :  { %1523 = vmatpush3.msra.mxu0 %v1877_v9 }
 0xdd6   :  { %1538 = vmatprep.subr.mxu0 %v1784_v1 }
 0xe8e   :  { %v889_v5 = vpop.f32.mrf.mxu0 }
 0xe8f   :  { %v890_v7 = vadd.f32 %v889_v5, %v817_v2 }
 0xe90   :  { %v1504_v8 = vpop.f32.mrf.mxu0 }
 0xe91   :  { %1604 = vtanh.f32 %v890_v7  ;;  %v893_v11 = vsub.f32 0.0, %v890_v7  ;;  %v1117_v8 = vld [vmem:[#allocation2 + $0x10] sm:$0x3] }
 0xe93   :  { %v894_v12 = vmul.f32 1.442695, %v893_v11 }
 0xe95   :  { %1606 = vpow2.f32 %v894_v12 }
 0xe9e   :  { %v1605_v10 = vpop.eup %1604 }
 0xe9f   :  { %902 = vrot.lane.b32.xlu0 %v1605_v10, %s1786_s30 }
 0xea2   :  { %v1607_v13 = vpop.eup %1606 }
 0xea3   :  { %v896_v14 = vadd.f32 1.0, %v1607_v13 }
 0xea5   :  { %1608 = vrcp.f32 %v896_v14 }
 0xeb2   :  { %v1609_v15 = vpop.eup %1608 }
 0xeb3   :  { %v900_v18 = vmul.f32 %v1609_v15, %v810_v57 }
 0xf11   :  { %v903_v16 = vpop.permute.xlu0 %902 }
 0xf12   :  { %v905_v17 = vmul.f32 %v1609_v15, %v903_v16 }
 0xf14   :  { %907 = vrot.lane.b32.xlu1 %v905_v17, %s1787_s3 }
 0xf86   :  { %v908_v19 = vpop.permute.xlu1 %907 }
 0xf87   :  { %v910_v20 = vadd.f32 %v908_v19, %v900_v18 }
 0xf89   :  { %1610 = vtanh.f32 %v910_v20 }
 0xf96   :  { %v1611_v21 = vpop.eup %1610 }
 0xf97   :  { %913 = vrot.lane.b32.xlu0 %v1611_v21, %s1786_s30 }
0x1009   :  { %v914_v25 = vpop.permute.xlu0 %913 }
0x100a   :  { %v916_v26 = vmul.f32 %v1609_v15, %v914_v25  ;;  %v1219_v25 = vld [vmem:[#allocation13 + $0x10] sm:$0xff] }
0x100c   :  { %919 = vrot.lane.b32.xlu1 %v916_v26, %s1787_s3  ;;  %v1218_v26 = vld [vmem:[#allocation13 + $0x8] sm:$0xff] }
0x107e   :  { %v920_v27 = vpop.permute.xlu1 %919 }
0x107f   :  { %1514 = vmatmul.mubr.msk.f32.vlgmr.msra.gmra.mxu1 %vm119_vm1, %v920_v27  ;;  %v1217_v27 = vld [vmem:[#allocation13] sm:$0xff] }
0x1080   :  { %1528 = vmatpush3.msra.mxu1 %v1864_v3  ;;  %1535 = vmatprep.mubr.msk.f32.mxu1 %vm1785_vm0, %v1784_v1 }
0x1081   :  { %1529 = vmatprep.subr.mxu1 %v1784_v1 }
0x1082   :  { %1530 = vmatpush3.msra.mxu1 %v1867_v4 }
0x1083   :  { %1531 = vmatprep.subr.mxu1 %v1784_v1 }
0x1084   :  { %1532 = vmatpush3.msra.mxu1 %v1872_v6 }
0x1085   :  { %1533 = vmatprep.subr.mxu1 %v1784_v1 }
0x1086   :  { %1534 = vmatpush3.msra.mxu1 %v1877_v9 }
0x113f   :  { %v989_v29 = vpop.f32.mrf.mxu1 }
0x1140   :  { %v990_v30 = vadd.f32 %v989_v29, %v917_v28 }
0x1141   :  { %v1515_v31 = vpop.f32.mrf.mxu1 }
0x1142   :  { %1612 = vtanh.f32 %v990_v30  ;;  %v993_v32 = vsub.f32 0.0, %v990_v30 }
0x1144   :  { %v994_v33 = vmul.f32 1.442695, %v993_v32 }
0x1146   :  { %1614 = vpow2.f32 %v994_v33 }
0x114f   :  { %v1613_v3 = vpop.eup %1612 }
0x1150   :  { %1002 = vrot.lane.b32.xlu0 %v1613_v3, %s1786_s30  ;;  %v1371_v3 = vld [vmem:[%s2042_s7] ss:$0 sm:$0xff] }
0x1153   :  { %v1615_v4 = vpop.eup %1614 }
0x1154   :  { %v996_v34 = vadd.f32 1.0, %v1615_v4 }
0x1156   :  { %1616 = vrcp.f32 %v996_v34 }
0x1163   :  { %v1617_v35 = vpop.eup %1616 }
0x1164   :  { %v1000_v9 = vmul.f32 %v1617_v35, %v910_v20 }
0x11c2   :  { %v1003_v6 = vpop.permute.xlu0 %1002 }
0x11c3   :  { %v1005_v36 = vmul.f32 %v1617_v35, %v1003_v6 }
0x11c5   :  { %1007 = vrot.lane.b32.xlu1 %v1005_v36, %s1787_s3 }
0x1237   :  { %v1008_v37 = vpop.permute.xlu1 %1007 }
0x1238   :  { %v1010_v38 = vadd.f32 %v1008_v37, %v1000_v9 }
0x123a   :  { %1618 = vtanh.f32 %v1010_v38 }
0x1247   :  { %v1619_v39 = vpop.eup %1618 }
0x1248   :  { %1013 = vrot.lane.b32.xlu0 %v1619_v39, %s1786_s30 }
0x12ba   :  { %v1014_v43 = vpop.permute.xlu0 %1013 }
0x12bb   :  { %v1016_v44 = vmul.f32 %v1617_v35, %v1014_v43 }
0x12bd   :  { %1019 = vrot.lane.b32.xlu1 %v1016_v44, %s1787_s3 }
0x132f   :  { %v1020_v45 = vpop.permute.xlu1 %1019 }
0x1330   :  { %1525 = vmatmul.mubr.msk.f32.vlgmr.msra.gmra.mxu0 %vm119_vm1, %v1020_v45 }
0x1331   :  { %1546 = vmatprep.mubr.msk.f32.mxu0 %vm1785_vm0, %v1784_v1  ;;  %1539 = vmatpush3.msra.mxu0 %v1220_v24 }
0x1332   :  { %1540 = vmatprep.subr.mxu0 %v1784_v1 }
0x1333   :  { %1541 = vmatpush3.msra.mxu0 %v1219_v25 }
0x1334   :  { %1542 = vmatprep.subr.mxu0 %v1784_v1 }
0x1335   :  { %1543 = vmatpush3.msra.mxu0 %v1218_v26 }
0x1336   :  { %1544 = vmatprep.subr.mxu0 %v1784_v1 }
0x1337   :  { %1545 = vmatpush3.msra.mxu0 %v1217_v27 }
0x13f0   :  { %v1089_v47 = vpop.f32.mrf.mxu0 }
0x13f1   :  { %v1090_v48 = vadd.f32 %v1089_v47, %v1017_v46 }
0x13f2   :  { %v1526_v49 = vpop.f32.mrf.mxu0 }
0x13f3   :  { %1620 = vtanh.f32 %v1090_v48  ;;  %v1093_v51 = vsub.f32 0.0, %v1090_v48 }
0x13f5   :  { %v1094_v52 = vmul.f32 1.442695, %v1093_v51 }
0x13f7   :  { %1622 = vpow2.f32 %v1094_v52 }
0x1400   :  { %v1621_v50 = vpop.eup %1620 }
0x1401   :  { %1102 = vrot.lane.b32.xlu0 %v1621_v50, %s1786_s30 }
0x1404   :  { %v1623_v53 = vpop.eup %1622 }
0x1405   :  { %v1096_v54 = vadd.f32 1.0, %v1623_v53 }
0x1407   :  { %1624 = vrcp.f32 %v1096_v54 }
0x1414   :  { %v1625_v55 = vpop.eup %1624 }
0x1415   :  { %v1100_v58 = vmul.f32 %v1625_v55, %v1010_v38 }
0x1473   :  { %v1103_v56 = vpop.permute.xlu0 %1102 }
0x1474   :  { %v1105_v57 = vmul.f32 %v1625_v55, %v1103_v56 }
0x1476   :  { %1107 = vrot.lane.b32.xlu1 %v1105_v57, %s1787_s3 }
0x14e8   :  { %v1108_v59 = vpop.permute.xlu1 %1107 }
0x14e9   :  { %v1110_v60 = vadd.f32 %v1108_v59, %v1100_v58 }
0x14eb   :  { %1626 = vtanh.f32 %v1110_v60 }
0x14f8   :  { %v1627_v61 = vpop.eup %1626 }
0x14f9   :  { %1113 = vrot.lane.b32.xlu0 %v1627_v61, %s1786_s30 }
0x156b   :  { %v1114_v2 = vpop.permute.xlu0 %1113 }
0x156c   :  { %v1116_v5 = vmul.f32 %v1625_v55, %v1114_v2 }
0x156e   :  { %1119 = vrot.lane.b32.xlu1 %v1116_v5, %s1787_s3 }
0x15e0   :  { %v1120_v7 = vpop.permute.xlu1 %1119 }
0x15e1   :  { %1536 = vmatmul.mubr.msk.f32.vlgmr.msra.gmra.mxu1 %vm119_vm1, %v1120_v7 }
0x16a1   :  { %v1189_v10 = vpop.f32.mrf.mxu1 }
0x16a2   :  { %v1190_v11 = vadd.f32 %v1189_v10, %v1117_v8 }
0x16a3   :  { %v1537_v12 = vpop.f32.mrf.mxu1 }
0x16a4   :  { %1628 = vtanh.f32 %v1190_v11  ;;  %v1193_v14 = vsub.f32 0.0, %v1190_v11 }
0x16a6   :  { %v1194_v15 = vmul.f32 1.442695, %v1193_v14 }
0x16a8   :  { %1630 = vpow2.f32 %v1194_v15 }
0x16b1   :  { %v1629_v13 = vpop.eup %1628 }
0x16b2   :  { %1202 = vrot.lane.b32.xlu0 %v1629_v13, %s1786_s30 }
0x16b5   :  { %v1631_v16 = vpop.eup %1630 }
0x16b6   :  { %v1196_v17 = vadd.f32 1.0, %v1631_v16 }
0x16b8   :  { %1632 = vrcp.f32 %v1196_v17 }
0x16c5   :  { %v1633_v18 = vpop.eup %1632 }
0x16c6   :  { %v1200_v21 = vmul.f32 %v1633_v18, %v1110_v60 }
0x1724   :  { %v1203_v19 = vpop.permute.xlu0 %1202 }
0x1725   :  { %v1205_v20 = vmul.f32 %v1633_v18, %v1203_v19 }
0x1727   :  { %1207 = vrot.lane.b32.xlu1 %v1205_v20, %s1787_s3 }
0x1799   :  { %v1208_v22 = vpop.permute.xlu1 %1207 }
0x179a   :  { %v1210_v23 = vadd.f32 %v1208_v22, %v1200_v21 }
0x179c   :  { %1634 = vtanh.f32 %v1210_v23 }
0x17a9   :  { %v1635_v28 = vpop.eup %1634 }
0x17aa   :  { %1213 = vrot.lane.b32.xlu0 %v1635_v28, %s1786_s30 }
0x181c   :  { %v1214_v29 = vpop.permute.xlu0 %1213 }
0x181d   :  { %v1216_v30 = vmul.f32 %v1633_v18, %v1214_v29 }
0x181f   :  { %1229 = vrot.lane.b32.xlu1 %v1216_v30, %s1787_s3 }
0x1891   :  { %v1230_v31 = vpop.permute.xlu1 %1229 }
0x1892   :  { %1547 = vmatmul.mubr.msk.f32.vlgmr.msra.gmra.mxu0 %vm119_vm1, %v1230_v31 }
0x1952   :  { %v1299_v32 = vpop.f32.mrf.mxu0 }
0x1953   :  { %v1300_v33 = vadd.f32 %v1371_v3, %v1299_v32 }
0x1954   :  { %v1548_v1 = vpop.f32.mrf.mxu0 }
0x1955   :  { %1303 = vst [vmem:[#allocation14] sm:$0x3] %v1300_v33 }
0x1956   :  { %1755 = shalt.err (!%p1752_p1)
}
0x1957   :  { %1313 = dma.vmem_to_hbm [thread:$0]  %s1311_s19, 32, %s2043_s8, [#allocation5]  }
0x1958   :  { %1772 = dma.done.wait [#allocation5], 32  }
0x1959   :  { %1773 = vsyncadd [#allocation5], 4294967264 }
0x195a   :  { %1317 = vsyncpa [#allocation4], 1 }
0x195b   :  { %1318 = vsyncpa [#allocation9], 1 }
0x195c   :  { %1319 = vsyncpa [#allocation12], 1 }
0x195d   :  { %1320 = vsyncpa [#allocation5], 1 }
0x195e   :  { %1321 = vsyncpa [#allocation6], 1 }

</bundles_post_ra>
